<compile_context>
chip_gen: v7x
topology: tpu7x:2x2x1
jax: 0.10.0
libtpu: 0.0.40
codegen_flags: <defaults>
</compile_context>

<pallas_src>
import functools

import jax
import jax.numpy as jnp
from jax.experimental import pallas as pl
from jax.experimental.pallas import tpu as pltpu

TEMPERATURE = 0.5
NORM_EPS = 1e-12            # F.normalize default eps
_NORM_EPS2 = NORM_EPS * NORM_EPS


def _round_up(x, m):
    return ((x + m - 1) // m) * m


def _tpu_vmem_capacity_bytes():
    """Physical VMEM per TensorCore; conservative (v7x-sized) fallback."""
    try:
        cap = int(pltpu.get_tpu_info().vmem_capacity_bytes)
        if cap > 0:
            return cap
    except Exception:
        pass
    return 64 << 20


def _choose_block_rows(batch, feat, itemsize, vmem_clamp):
    # Budget = requested VMEM limit minus headroom for the double-buffered
    # output tile and Mosaic-internal scratch.
    budget = max(4 << 20, vmem_clamp - (6 << 20))
    # Per-row bytes per grid step: 4 inputs x double buffer, ~6 f32 rows of
    # fused-reduce temporaries, plus small per-row reduce/matmul outputs.
    per_row = 8 * feat * itemsize + 6 * feat * 4 + 1024
    tb = max(8, (budget // per_row) // 8 * 8)
    # Keep >= 2 roughly balanced tiles so the "parallel" batch axis can be
    # sharded across v7x's two TensorCores (no measurable cost on 1-TC parts).
    if batch > 8:
        tb = min(tb, _round_up(-(-batch // 2), 8))
    tb = min(tb, _round_up(batch, 8))
    return int(max(8, tb))


def _infonce_partial_kernel(b1_ref, n1_ref, n2_ref, b2_ref, out_ref, *,
                            block_rows, batch, temperature, mxu_reduce):
    tb = block_rows
    f32 = jnp.float32

    b1 = b1_ref[...]
    n1 = n1_ref[...]
    n2 = n2_ref[...]
    b2 = b2_ref[...]

    if mxu_reduce:
        d = b1.shape[-1]
        ones = jnp.ones((d, 128), dtype=b1.dtype)
        prec = (jax.lax.Precision.HIGHEST
                if jnp.dtype(b1.dtype) == jnp.float32 else None)

        def rowdot(a, b):
            # Pair multiply on the VPU; D-axis reduce adds on the (idle) MXU,
            # f32 accumulation. Lane 0 of the (TB, 128) result is the row dot.
            return jnp.dot(a * b, ones, precision=prec,
                           preferred_element_type=jnp.float32)[:, :1]
    else:
        def rowdot(a, b):
            # Fused multiply + lane reduce, f32 accumulation.  No stacked
            # (10, TB, D) temporary is ever materialized.
            return jnp.sum(a.astype(f32) * b.astype(f32),
                           axis=-1, keepdims=True)

    # 4 squared norms + 6 pairwise raw dot products (on unnormalized rows).
    ss_b1 = rowdot(b1, b1)
    ss_n1 = rowdot(n1, n1)
    ss_n2 = rowdot(n2, n2)
    ss_b2 = rowdot(b2, b2)
    d_pos = rowdot(b1, n2)                  # positive pair
    d_n1b1 = rowdot(n1, b1)                 # negative pairs
    d_n2b2 = rowdot(n2, b2)
    d_n1n2 = rowdot(n1, n2)
    d_b1b2 = rowdot(b1, b2)
    d_n1b2 = rowdot(n1, b2)

    # F.normalize: x / max(||x||, eps)  ==  x * rsqrt(max(||x||^2, eps^2)).
    eps2 = jnp.float32(_NORM_EPS2)
    inv_b1 = jax.lax.rsqrt(jnp.maximum(ss_b1, eps2))
    inv_n1 = jax.lax.rsqrt(jnp.maximum(ss_n1, eps2))
    inv_n2 = jax.lax.rsqrt(jnp.maximum(ss_n2, eps2))
    inv_b2 = jax.lax.rsqrt(jnp.maximum(ss_b2, eps2))

    inv_t = jnp.float32(1.0 / temperature)

    # Mask rows beyond the true batch size (padding of the last tile).
    row = pl.program_id(0) * tb + jax.lax.broadcasted_iota(jnp.int32, (tb, 1), 0)
    valid = row < batch

    # Positive branch: only the cosine is needed (log cancellation outside).
    sum_pos = jnp.sum(jnp.where(valid, d_pos * (inv_b1 * inv_n2), 0.0))

    # Negative branch: exp(cos/T) for each of the five pairs, masked, summed.
    def exp_sum(d_ab, inv_a, inv_b):
        return jnp.sum(jnp.where(valid,
                                 jnp.exp(d_ab * (inv_a * inv_b) * inv_t),
                                 0.0))

    sum_neg = (exp_sum(d_n1b1, inv_n1, inv_b1)
               + exp_sum(d_n2b2, inv_n2, inv_b2)
               + exp_sum(d_n1n2, inv_n1, inv_n2)
               + exp_sum(d_b1b2, inv_b1, inv_b2)
               + exp_sum(d_n1b2, inv_n1, inv_b2))

    # Lane-dense (1,8,128) partial tile: sublane 0 = sum_pos, sublane 1 = sum_neg.
    sub = jax.lax.broadcasted_iota(jnp.int32, out_ref.shape, 1)
    out_ref[...] = jnp.where(sub == 0, sum_pos,
                             jnp.where(sub == 1, sum_neg, jnp.float32(0.0)))


def infonce_loss(before_out1, now_out1, now_out2, before_out2, *,
                 temperature=TEMPERATURE, block_rows=None, mxu_reduce=None):
    B, D = before_out1.shape
    itemsize = jnp.dtype(before_out1.dtype).itemsize

    vmem_cap = _tpu_vmem_capacity_bytes()
    # v7x has ~64 MiB physical VMEM per TensorCore (vs 128 MiB on v5e/v6e):
    # clamp the requested scoped limit to half of physical, max 64 MiB.
    vmem_clamp = int(min(vmem_cap // 2, 64 << 20))
    if mxu_reduce is None:
        # On v7x-like parts HBM outruns the VPU; offload the reduce to the MXU.
        mxu_reduce = vmem_cap <= (64 << 20)

    if block_rows is None:
        TB = _choose_block_rows(B, D, itemsize, vmem_clamp)
    else:
        TB = max(8, (int(block_rows) // 8) * 8)
    num_tiles = pl.cdiv(B, TB)

    kernel = functools.partial(
        _infonce_partial_kernel,
        block_rows=TB, batch=B, temperature=float(temperature),
        mxu_reduce=bool(mxu_reduce))

    in_spec = pl.BlockSpec((TB, D), lambda i: (i, 0))

    partials = pl.pallas_call(
        kernel,
        out_shape=jax.ShapeDtypeStruct((num_tiles, 8, 128), jnp.float32),
        grid_spec=pltpu.PrefetchScalarGridSpec(
            num_scalar_prefetch=0,
            grid=(num_tiles,),
            in_specs=[in_spec, in_spec, in_spec, in_spec],
            out_specs=pl.BlockSpec((1, 8, 128), lambda i: (i, 0, 0)),
        ),
        compiler_params=pltpu.CompilerParams(
            dimension_semantics=("parallel",),
            vmem_limit_bytes=vmem_clamp,
        ),
    )(before_out1, now_out1, now_out2, before_out2)

    sum_pos_cos = jnp.sum(partials[:, 0, 0])
    sum_exp_neg = jnp.sum(partials[:, 1, 0])
    # loss = mean_b(-log(exp(cos_pos/T) / sum_exp_neg))
    #      = log(sum_exp_neg) - mean_b(cos_pos) / T
    return jnp.log(sum_exp_neg) - (sum_pos_cos / B) / temperature


def _reference(before_out1, now_out1, now_out2, before_out2,
               temperature=TEMPERATURE):
    # Pure-JAX mirror of the torch module (exp/log path) for sanity checking.
    def norm(x):
        n = jnp.sqrt(jnp.sum(x * x, axis=1, keepdims=True))
        return x / jnp.maximum(n, NORM_EPS)

    b1, n1, n2, b2 = map(norm, (before_out1, now_out1, now_out2, before_out2))
    cos = lambda a, b: jnp.sum(a * b, axis=1)
    pos = jnp.exp(cos(b1, n2) / temperature)
    negs = jnp.concatenate([
        jnp.exp(cos(n1, b1) / temperature),
        jnp.exp(cos(n2, b2) / temperature),
        jnp.exp(cos(n1, n2) / temperature),
        jnp.exp(cos(b1, b2) / temperature),
        jnp.exp(cos(n1, b2) / temperature),
    ], axis=0)
    return jnp.mean(-jnp.log(pos / jnp.sum(negs)))


if __name__ == "__main__":
    key = jax.random.PRNGKey(0)
    k1, k2, k3, k4 = jax.random.split(key, 4)
    B, D = 12, 32   # small shapes; B deliberately not a multiple of the tile
    before_out1 = jax.random.normal(k1, (B, D), dtype=jnp.float32)
    now_out1 = jax.random.normal(k2, (B, D), dtype=jnp.float32)
    now_out2 = jax.random.normal(k3, (B, D), dtype=jnp.float32)
    before_out2 = jax.random.normal(k4, (B, D), dtype=jnp.float32)

    ref = _reference(before_out1, now_out1, now_out2, before_out2)

    # Auto path: two tiles of 8 rows (last tile has 4 padded rows, masked).
    loss = jax.block_until_ready(
        infonce_loss(before_out1, now_out1, now_out2, before_out2))
    assert jnp.allclose(loss, ref, rtol=1e-5, atol=1e-5), (loss, ref)

    # Single-tile path (block larger than the batch), VPU reduce.
    loss_single = jax.block_until_ready(
        infonce_loss(before_out1, now_out1, now_out2, before_out2,
                     block_rows=16, mxu_reduce=False))
    assert jnp.allclose(loss_single, ref, rtol=1e-5, atol=1e-5), (loss_single, ref)

    # MXU-reduce path (v7x-targeted); validated on whatever generation runs this.
    loss_mxu = jax.block_until_ready(
        infonce_loss(before_out1, now_out1, now_out2, before_out2,
                     block_rows=8, mxu_reduce=True))
    assert jnp.allclose(loss_mxu, ref, rtol=1e-5, atol=1e-5), (loss_mxu, ref)

    print("KERNEL_OK")
</pallas_src>

<mosaic_0001>
module attributes {stable_mosaic.version = 11 : i64} {
  func.func @_infonce_partial_kernel(%arg0: i32, %arg1: memref<8x32xf32, #tpu.memory_space<vmem>>, %arg2: memref<8x32xf32, #tpu.memory_space<vmem>>, %arg3: memref<8x32xf32, #tpu.memory_space<vmem>>, %arg4: memref<8x32xf32, #tpu.memory_space<vmem>>, %arg5: memref<1x8x128xf32, #tpu.memory_space<vmem>>) attributes {dimension_semantics = [#tpu.dimension_semantics<parallel>], iteration_bounds = array<i64: 2>, scalar_prefetch = 0 : i64, scratch_operands = 0 : i64, tpu.core_type = #tpu.core_type<tc>, window_params = [{transform_indices = @transform_0, window_bounds = array<i64: 8, 32>}, {transform_indices = @transform_1, window_bounds = array<i64: 8, 32>}, {transform_indices = @transform_2, window_bounds = array<i64: 8, 32>}, {transform_indices = @transform_3, window_bounds = array<i64: 8, 32>}, {transform_indices = @transform_4, window_bounds = array<i64: 1, 8, 128>}]} {
    %c0 = arith.constant 0 : index
    %c0_0 = arith.constant 0 : index
    %0 = vector.load %arg1[%c0, %c0_0] : memref<8x32xf32, #tpu.memory_space<vmem>>, vector<8x32xf32>
    %c0_1 = arith.constant 0 : index
    %c0_2 = arith.constant 0 : index
    %1 = vector.load %arg2[%c0_1, %c0_2] : memref<8x32xf32, #tpu.memory_space<vmem>>, vector<8x32xf32>
    %c0_3 = arith.constant 0 : index
    %c0_4 = arith.constant 0 : index
    %2 = vector.load %arg3[%c0_3, %c0_4] : memref<8x32xf32, #tpu.memory_space<vmem>>, vector<8x32xf32>
    %c0_5 = arith.constant 0 : index
    %c0_6 = arith.constant 0 : index
    %3 = vector.load %arg4[%c0_5, %c0_6] : memref<8x32xf32, #tpu.memory_space<vmem>>, vector<8x32xf32>
    %cst = arith.constant 1.000000e+00 : f32
    %4 = vector.broadcast %cst : f32 to vector<32x128xf32>
    %5 = arith.mulf %0, %0 : vector<8x32xf32>
    %cst_7 = arith.constant dense<0.000000e+00> : vector<8x128xf32>
    %6 = tpu.matmul %5, %4, %cst_7 {dimension_numbers = #tpu.dot_dimension_numbers<[1], [0], [0], [1], [0, 0, 1, 1], [], []>, precision = #tpu.contract_precision<fp32>} : vector<8x32xf32>, vector<32x128xf32>, vector<8x128xf32> -> vector<8x128xf32>
    %7 = vector.extract_strided_slice %6 {offsets = [0, 0], sizes = [8, 1], strides = [1, 1]} : vector<8x128xf32> to vector<8x1xf32>
    %8 = arith.mulf %1, %1 : vector<8x32xf32>
    %cst_8 = arith.constant dense<0.000000e+00> : vector<8x128xf32>
    %9 = tpu.matmul %8, %4, %cst_8 {dimension_numbers = #tpu.dot_dimension_numbers<[1], [0], [0], [1], [0, 0, 1, 1], [], []>, precision = #tpu.contract_precision<fp32>} : vector<8x32xf32>, vector<32x128xf32>, vector<8x128xf32> -> vector<8x128xf32>
    %10 = vector.extract_strided_slice %9 {offsets = [0, 0], sizes = [8, 1], strides = [1, 1]} : vector<8x128xf32> to vector<8x1xf32>
    %11 = arith.mulf %2, %2 : vector<8x32xf32>
    %cst_9 = arith.constant dense<0.000000e+00> : vector<8x128xf32>
    %12 = tpu.matmul %11, %4, %cst_9 {dimension_numbers = #tpu.dot_dimension_numbers<[1], [0], [0], [1], [0, 0, 1, 1], [], []>, precision = #tpu.contract_precision<fp32>} : vector<8x32xf32>, vector<32x128xf32>, vector<8x128xf32> -> vector<8x128xf32>
    %13 = vector.extract_strided_slice %12 {offsets = [0, 0], sizes = [8, 1], strides = [1, 1]} : vector<8x128xf32> to vector<8x1xf32>
    %14 = arith.mulf %3, %3 : vector<8x32xf32>
    %cst_10 = arith.constant dense<0.000000e+00> : vector<8x128xf32>
    %15 = tpu.matmul %14, %4, %cst_10 {dimension_numbers = #tpu.dot_dimension_numbers<[1], [0], [0], [1], [0, 0, 1, 1], [], []>, precision = #tpu.contract_precision<fp32>} : vector<8x32xf32>, vector<32x128xf32>, vector<8x128xf32> -> vector<8x128xf32>
    %16 = vector.extract_strided_slice %15 {offsets = [0, 0], sizes = [8, 1], strides = [1, 1]} : vector<8x128xf32> to vector<8x1xf32>
    %17 = arith.mulf %0, %2 : vector<8x32xf32>
    %cst_11 = arith.constant dense<0.000000e+00> : vector<8x128xf32>
    %18 = tpu.matmul %17, %4, %cst_11 {dimension_numbers = #tpu.dot_dimension_numbers<[1], [0], [0], [1], [0, 0, 1, 1], [], []>, precision = #tpu.contract_precision<fp32>} : vector<8x32xf32>, vector<32x128xf32>, vector<8x128xf32> -> vector<8x128xf32>
    %19 = vector.extract_strided_slice %18 {offsets = [0, 0], sizes = [8, 1], strides = [1, 1]} : vector<8x128xf32> to vector<8x1xf32>
    %20 = arith.mulf %1, %0 : vector<8x32xf32>
    %cst_12 = arith.constant dense<0.000000e+00> : vector<8x128xf32>
    %21 = tpu.matmul %20, %4, %cst_12 {dimension_numbers = #tpu.dot_dimension_numbers<[1], [0], [0], [1], [0, 0, 1, 1], [], []>, precision = #tpu.contract_precision<fp32>} : vector<8x32xf32>, vector<32x128xf32>, vector<8x128xf32> -> vector<8x128xf32>
    %22 = vector.extract_strided_slice %21 {offsets = [0, 0], sizes = [8, 1], strides = [1, 1]} : vector<8x128xf32> to vector<8x1xf32>
    %23 = arith.mulf %2, %3 : vector<8x32xf32>
    %cst_13 = arith.constant dense<0.000000e+00> : vector<8x128xf32>
    %24 = tpu.matmul %23, %4, %cst_13 {dimension_numbers = #tpu.dot_dimension_numbers<[1], [0], [0], [1], [0, 0, 1, 1], [], []>, precision = #tpu.contract_precision<fp32>} : vector<8x32xf32>, vector<32x128xf32>, vector<8x128xf32> -> vector<8x128xf32>
    %25 = vector.extract_strided_slice %24 {offsets = [0, 0], sizes = [8, 1], strides = [1, 1]} : vector<8x128xf32> to vector<8x1xf32>
    %26 = arith.mulf %1, %2 : vector<8x32xf32>
    %cst_14 = arith.constant dense<0.000000e+00> : vector<8x128xf32>
    %27 = tpu.matmul %26, %4, %cst_14 {dimension_numbers = #tpu.dot_dimension_numbers<[1], [0], [0], [1], [0, 0, 1, 1], [], []>, precision = #tpu.contract_precision<fp32>} : vector<8x32xf32>, vector<32x128xf32>, vector<8x128xf32> -> vector<8x128xf32>
    %28 = vector.extract_strided_slice %27 {offsets = [0, 0], sizes = [8, 1], strides = [1, 1]} : vector<8x128xf32> to vector<8x1xf32>
    %29 = arith.mulf %0, %3 : vector<8x32xf32>
    %cst_15 = arith.constant dense<0.000000e+00> : vector<8x128xf32>
    %30 = tpu.matmul %29, %4, %cst_15 {dimension_numbers = #tpu.dot_dimension_numbers<[1], [0], [0], [1], [0, 0, 1, 1], [], []>, precision = #tpu.contract_precision<fp32>} : vector<8x32xf32>, vector<32x128xf32>, vector<8x128xf32> -> vector<8x128xf32>
    %31 = vector.extract_strided_slice %30 {offsets = [0, 0], sizes = [8, 1], strides = [1, 1]} : vector<8x128xf32> to vector<8x1xf32>
    %32 = arith.mulf %1, %3 : vector<8x32xf32>
    %cst_16 = arith.constant dense<0.000000e+00> : vector<8x128xf32>
    %33 = tpu.matmul %32, %4, %cst_16 {dimension_numbers = #tpu.dot_dimension_numbers<[1], [0], [0], [1], [0, 0, 1, 1], [], []>, precision = #tpu.contract_precision<fp32>} : vector<8x32xf32>, vector<32x128xf32>, vector<8x128xf32> -> vector<8x128xf32>
    %34 = vector.extract_strided_slice %33 {offsets = [0, 0], sizes = [8, 1], strides = [1, 1]} : vector<8x128xf32> to vector<8x1xf32>
    %cst_17 = arith.constant 1.000000e-24 : f32
    %35 = vector.broadcast %cst_17 : f32 to vector<8x1xf32>
    %36 = arith.maximumf %7, %35 : vector<8x1xf32>
    %37 = math.rsqrt %36 : vector<8x1xf32>
    %cst_18 = arith.constant 1.000000e-24 : f32
    %38 = vector.broadcast %cst_18 : f32 to vector<8x1xf32>
    %39 = arith.maximumf %10, %38 : vector<8x1xf32>
    %40 = math.rsqrt %39 : vector<8x1xf32>
    %cst_19 = arith.constant 1.000000e-24 : f32
    %41 = vector.broadcast %cst_19 : f32 to vector<8x1xf32>
    %42 = arith.maximumf %13, %41 : vector<8x1xf32>
    %43 = math.rsqrt %42 : vector<8x1xf32>
    %cst_20 = arith.constant 1.000000e-24 : f32
    %44 = vector.broadcast %cst_20 : f32 to vector<8x1xf32>
    %45 = arith.maximumf %16, %44 : vector<8x1xf32>
    %46 = math.rsqrt %45 : vector<8x1xf32>
    %c8_i32 = arith.constant 8 : i32
    %47 = arith.muli %arg0, %c8_i32 : i32
    %48 = tpu.iota {dimensions = array<i32: 0>} : vector<8x1xi32>
    %49 = vector.broadcast %47 : i32 to vector<8x1xi32>
    %50 = arith.addi %49, %48 : vector<8x1xi32>
    %c12_i32 = arith.constant 12 : i32
    %51 = vector.broadcast %c12_i32 : i32 to vector<8x1xi32>
    %52 = arith.cmpi slt, %50, %51 : vector<8x1xi32>
    %53 = arith.mulf %37, %43 : vector<8x1xf32>
    %54 = arith.mulf %19, %53 : vector<8x1xf32>
    %cst_21 = arith.constant 0.000000e+00 : f32
    %55 = vector.broadcast %cst_21 : f32 to vector<8x1xf32>
    %56 = arith.select %52, %54, %55 : vector<8x1xi1>, vector<8x1xf32>
    %57 = vector.shape_cast %56 : vector<8x1xf32> to vector<1x8x1xf32>
    %cst_22 = arith.constant dense<0.000000e+00> : vector<1xf32>
    %58 = vector.multi_reduction <add>, %57, %cst_22 [1, 2] : vector<1x8x1xf32> to vector<1xf32>
    %59 = vector.shape_cast %58 : vector<1xf32> to vector<1x1x1xf32>
    %60 = vector.extract %59[0, 0, 0] : f32 from vector<1x1x1xf32>
    %61 = arith.mulf %40, %37 : vector<8x1xf32>
    %62 = arith.mulf %22, %61 : vector<8x1xf32>
    %cst_23 = arith.constant 2.000000e+00 : f32
    %63 = vector.broadcast %cst_23 : f32 to vector<8x1xf32>
    %64 = arith.mulf %62, %63 : vector<8x1xf32>
    %65 = math.exp %64 : vector<8x1xf32>
    %cst_24 = arith.constant 0.000000e+00 : f32
    %66 = vector.broadcast %cst_24 : f32 to vector<8x1xf32>
    %67 = arith.select %52, %65, %66 : vector<8x1xi1>, vector<8x1xf32>
    %68 = vector.shape_cast %67 : vector<8x1xf32> to vector<1x8x1xf32>
    %cst_25 = arith.constant dense<0.000000e+00> : vector<1xf32>
    %69 = vector.multi_reduction <add>, %68, %cst_25 [1, 2] : vector<1x8x1xf32> to vector<1xf32>
    %70 = vector.shape_cast %69 : vector<1xf32> to vector<1x1x1xf32>
    %71 = vector.extract %70[0, 0, 0] : f32 from vector<1x1x1xf32>
    %72 = arith.mulf %43, %46 : vector<8x1xf32>
    %73 = arith.mulf %25, %72 : vector<8x1xf32>
    %cst_26 = arith.constant 2.000000e+00 : f32
    %74 = vector.broadcast %cst_26 : f32 to vector<8x1xf32>
    %75 = arith.mulf %73, %74 : vector<8x1xf32>
    %76 = math.exp %75 : vector<8x1xf32>
    %cst_27 = arith.constant 0.000000e+00 : f32
    %77 = vector.broadcast %cst_27 : f32 to vector<8x1xf32>
    %78 = arith.select %52, %76, %77 : vector<8x1xi1>, vector<8x1xf32>
    %79 = vector.shape_cast %78 : vector<8x1xf32> to vector<1x8x1xf32>
    %cst_28 = arith.constant dense<0.000000e+00> : vector<1xf32>
    %80 = vector.multi_reduction <add>, %79, %cst_28 [1, 2] : vector<1x8x1xf32> to vector<1xf32>
    %81 = vector.shape_cast %80 : vector<1xf32> to vector<1x1x1xf32>
    %82 = vector.extract %81[0, 0, 0] : f32 from vector<1x1x1xf32>
    %83 = arith.addf %71, %82 : f32
    %84 = arith.mulf %40, %43 : vector<8x1xf32>
    %85 = arith.mulf %28, %84 : vector<8x1xf32>
    %cst_29 = arith.constant 2.000000e+00 : f32
    %86 = vector.broadcast %cst_29 : f32 to vector<8x1xf32>
    %87 = arith.mulf %85, %86 : vector<8x1xf32>
    %88 = math.exp %87 : vector<8x1xf32>
    %cst_30 = arith.constant 0.000000e+00 : f32
    %89 = vector.broadcast %cst_30 : f32 to vector<8x1xf32>
    %90 = arith.select %52, %88, %89 : vector<8x1xi1>, vector<8x1xf32>
    %91 = vector.shape_cast %90 : vector<8x1xf32> to vector<1x8x1xf32>
    %cst_31 = arith.constant dense<0.000000e+00> : vector<1xf32>
    %92 = vector.multi_reduction <add>, %91, %cst_31 [1, 2] : vector<1x8x1xf32> to vector<1xf32>
    %93 = vector.shape_cast %92 : vector<1xf32> to vector<1x1x1xf32>
    %94 = vector.extract %93[0, 0, 0] : f32 from vector<1x1x1xf32>
    %95 = arith.addf %83, %94 : f32
    %96 = arith.mulf %37, %46 : vector<8x1xf32>
    %97 = arith.mulf %31, %96 : vector<8x1xf32>
    %cst_32 = arith.constant 2.000000e+00 : f32
    %98 = vector.broadcast %cst_32 : f32 to vector<8x1xf32>
    %99 = arith.mulf %97, %98 : vector<8x1xf32>
    %100 = math.exp %99 : vector<8x1xf32>
    %cst_33 = arith.constant 0.000000e+00 : f32
    %101 = vector.broadcast %cst_33 : f32 to vector<8x1xf32>
    %102 = arith.select %52, %100, %101 : vector<8x1xi1>, vector<8x1xf32>
    %103 = vector.shape_cast %102 : vector<8x1xf32> to vector<1x8x1xf32>
    %cst_34 = arith.constant dense<0.000000e+00> : vector<1xf32>
    %104 = vector.multi_reduction <add>, %103, %cst_34 [1, 2] : vector<1x8x1xf32> to vector<1xf32>
    %105 = vector.shape_cast %104 : vector<1xf32> to vector<1x1x1xf32>
    %106 = vector.extract %105[0, 0, 0] : f32 from vector<1x1x1xf32>
    %107 = arith.addf %95, %106 : f32
    %108 = arith.mulf %40, %46 : vector<8x1xf32>
    %109 = arith.mulf %34, %108 : vector<8x1xf32>
    %cst_35 = arith.constant 2.000000e+00 : f32
    %110 = vector.broadcast %cst_35 : f32 to vector<8x1xf32>
    %111 = arith.mulf %109, %110 : vector<8x1xf32>
    %112 = math.exp %111 : vector<8x1xf32>
    %cst_36 = arith.constant 0.000000e+00 : f32
    %113 = vector.broadcast %cst_36 : f32 to vector<8x1xf32>
    %114 = arith.select %52, %112, %113 : vector<8x1xi1>, vector<8x1xf32>
    %115 = vector.shape_cast %114 : vector<8x1xf32> to vector<1x8x1xf32>
    %cst_37 = arith.constant dense<0.000000e+00> : vector<1xf32>
    %116 = vector.multi_reduction <add>, %115, %cst_37 [1, 2] : vector<1x8x1xf32> to vector<1xf32>
    %117 = vector.shape_cast %116 : vector<1xf32> to vector<1x1x1xf32>
    %118 = vector.extract %117[0, 0, 0] : f32 from vector<1x1x1xf32>
    %119 = arith.addf %107, %118 : f32
    %120 = tpu.iota {dimensions = array<i32: 1>} : vector<1x8x128xi32>
    %c0_i32 = arith.constant 0 : i32
    %121 = vector.broadcast %c0_i32 : i32 to vector<1x8x128xi32>
    %122 = arith.cmpi eq, %120, %121 : vector<1x8x128xi32>
    %c1_i32 = arith.constant 1 : i32
    %123 = vector.broadcast %c1_i32 : i32 to vector<1x8x128xi32>
    %124 = arith.cmpi eq, %120, %123 : vector<1x8x128xi32>
    %cst_38 = arith.constant 0.000000e+00 : f32
    %125 = vector.broadcast %119 : f32 to vector<1x8x128xf32>
    %126 = vector.broadcast %cst_38 : f32 to vector<1x8x128xf32>
    %127 = arith.select %124, %125, %126 : vector<1x8x128xi1>, vector<1x8x128xf32>
    %128 = vector.broadcast %60 : f32 to vector<1x8x128xf32>
    %129 = arith.select %122, %128, %127 : vector<1x8x128xi1>, vector<1x8x128xf32>
    %c0_39 = arith.constant 0 : index
    %c0_40 = arith.constant 0 : index
    %c0_41 = arith.constant 0 : index
    %130 = vector.load %arg5[%c0_39, %c0_40, %c0_41] : memref<1x8x128xf32, #tpu.memory_space<vmem>>, vector<1x8x128xf32>
    tpu.vector_store %arg5[%c0_39, %c0_40, %c0_41], %129 {strides = array<i32>} : memref<1x8x128xf32, #tpu.memory_space<vmem>>, vector<1x8x128xf32>,
    return
  }
  func.func @transform_0(%arg0: i32) -> (i32, i32) {
    %c0_i32 = arith.constant 0 : i32
    %c0_i32_0 = arith.constant 0 : i32
    return %arg0, %c0_i32 : i32, i32
  }
  func.func @transform_1(%arg0: i32) -> (i32, i32) {
    %c0_i32 = arith.constant 0 : i32
    %c0_i32_0 = arith.constant 0 : i32
    return %arg0, %c0_i32 : i32, i32
  }
  func.func @transform_2(%arg0: i32) -> (i32, i32) {
    %c0_i32 = arith.constant 0 : i32
    %c0_i32_0 = arith.constant 0 : i32
    return %arg0, %c0_i32 : i32, i32
  }
  func.func @transform_3(%arg0: i32) -> (i32, i32) {
    %c0_i32 = arith.constant 0 : i32
    %c0_i32_0 = arith.constant 0 : i32
    return %arg0, %c0_i32 : i32, i32
  }
  func.func @transform_4(%arg0: i32) -> (i32, i32, i32) {
    %c0_i32 = arith.constant 0 : i32
    %c0_i32_0 = arith.constant 0 : i32
    %c0_i32_1 = arith.constant 0 : i32
    return %arg0, %c0_i32, %c0_i32_0 : i32, i32, i32
  }
}

</mosaic_0001>

<bundles_post_ra>
// kernel: tpu_custom_call.1
= control target key start
LH: loop header
LB: loop body
LE: loop exit
PB: predicated region body
PF: predicated region fallthrough
CT: control target
= control target key end

     0   :  { %s6923_s0 = inlined_call_operand.hbm [shape: f32[12,32], index: 0, kind: input, shape index: {}]   ;;  %s6924_s1 = inlined_call_operand.hbm [shape: f32[12,32], index: 1, kind: input, shape index: {}]   ;;  %s6925_s2 = inlined_call_operand.hbm [shape: f32[12,32], index: 2, kind: input, shape index: {}]   ;;  %s6926_s3 = inlined_call_operand.hbm [shape: f32[12,32], index: 3, kind: input, shape index: {}]   ;;  %s6927_s4 = inlined_call_operand.hbm [shape: f32[2,8,128], index: 4, kind: output, shape index: {}]  }
   0x1   :  { %6933 = sst [smem:[#allocation17_spill]] %s6924_s1 }
   0x2   :  { %9 = vsyncpa [#allocation3], 0 }
   0x3   :  { %11 = vsyncpa [#allocation3 + $0x1], 0 }
   0x4   :  { %12 = vsyncpa [#allocation6], 0 }
   0x5   :  { %14 = vsyncpa [#allocation6 + $0x1], 0 }
   0x6   :  { %15 = vsyncpa [#allocation9], 0 }
   0x7   :  { %17 = vsyncpa [#allocation9 + $0x1], 0 }
   0x8   :  { %18 = vsyncpa [#allocation4], 0 }
   0x9   :  { %20 = vsyncpa [#allocation4 + $0x1], 0  ;;  %s6222_s15 = smov 0   ;;  %s6224_s16 = smov 0  }
   0xa   :  { %s6226_s17 = smov 0   ;;  %s6228_s18 = smov 0  }
   0xb LB: > { %6934 = sst [smem:[#allocation15_spill]] %s6182_s17  ;;  %s6243_s19 = sadd.s32 4294967295, %s6186_s18   ;;  %s6186_s18 = sphi %s6228_s18, %s6957_s18   ;;  %s6182_s17 = sphi %s6226_s17, %s6956_s17   ;;  %s6178_s16 = sphi %s6224_s16, %s6955_s16   ;;  %s6174_s15 = sphi %s6222_s15, %s6954_s15  }
   0xc   : > { %s4965_s20 = sadd.s32 4294967294, %s6186_s18   ;;  %s6247_s21 = sadd.s32 1, %s6186_s18  }
   0xd   : > { %s33_s22 = sadd.s32 1, %s6182_s17  ;;  %s30_s23 = ssub.s32 %s6186_s18, %s6247_s21 }
   0xe   : > { %p40_p0 = scmp.ne.s32.totalorder %s6182_s17, %s6178_s16  ;;  %p31_p1 = scmp.eq.s32.totalorder %s30_s23, 0 }
   0xf   : > { %p41_p2 = scmp.eq.s32.totalorder %s6186_s18, 0  ;;  %p46_p3 = scmp.ne.s32.totalorder %s6178_s16, %s6174_s15 }
  0x10   : > { %p47_p4 = scmp.eq.s32.totalorder %s6243_s19, 0  ;;  %p148_p7 = scmp.eq.s32.totalorder %s6243_s19, 1 }
  0x11   : > { %s6259_s24 = scalar_select %p31_p1, %s6182_s17, %s33_s22  }
  0x12   : > { %p42_p5 = por %p41_p2, %p40_p0  ;;  %p6261_p6 = por %p47_p4, %p46_p3 }
  0x13   : > { %6935 = sst [smem:[#allocation16_spill]] %s6259_s24  ;;  %p154_p8 = scmp.eq.s32.totalorder %s4965_s20, 1 }
  0x14   : > { %s6936_s25 = scalar_select %p6261_p6, 1, 0 }
  0x15   : > { %p5936_p10 = scmp.lt.s32.totalorder %s6186_s18, 2  ;;  %p6268_p11 = por %p148_p7, %p40_p0 }
  0x16   : > { %p6272_p12 = por %p154_p8, %p46_p3  ;;  %s6277_s28 = sand.u32 1, %s6182_s17  }
  0x17   : > { %s6937_s26 = scalar_select %p6268_p11, 1, 0 }
  0x18   : > { %s6938_s27 = scalar_select %p6272_p12, 1, 0 }
  0x19   : > { %s6280_s29 = sshll.u32 %s6186_s18, 7  ;;  %s6283_s30 = sshll.u32 %s6277_s28, 3 }
  0x1a   : > { %p6285_p13 = pnand %p5936_p10, %p42_p5  ;;  %s192_s6 = sand.u32 1, %s6186_s18  }
  0x1b   : > { %s6940_s1 = sld [smem:[#allocation17_spill]]  ;;  %s196_s10 = scalar_lea.vmem [#allocation5], %s6283_s30 }
  0x1c   : > { %s6939_s5 = scalar_select %p6285_p13, 1, 0 }
  0x1d   : > { %s203_s11 = sshll.u32 %s196_s10, 4  ;;  %s6300_s12 = scalar_lea.sflag [#allocation6], %s192_s6  ;;  %s6297_s11 = int_to_ptr.vmem [resolvable:$true] %s203_s11 }
  0x1e   : > { %p6306_p2 = pneg %p6285_p13 }
  0x21   : > { %s6294_s9 = scalar_lea.hbm %s6940_s1, %s6280_s29  ;;  %s5997_s23 = scalar_lea.hbm %s6940_s1, 256 }
  0x22   : > { %s5992_s13 = scalar_lea.hbm %s6294_s9, 128  ;;  %p5998_p5 = scmp.lt.u32.totalorder %s6294_s9, %s6940_s1 }
  0x23   : > { %p5993_p1 = scmp.ne.s32.totalorder %s6294_s9, %s5992_s13  ;;  %p5999_p7 = scmp.lt.u32.totalorder %s5997_s23, %s5992_s13 }
  0x24   : > { %p6001_p10 = scmp.lt.u32.totalorder %s5992_s13, %s6294_s9 }
  0x25   : > { %p5995_p3 = pnand %p6306_p2, %p5993_p1  ;;  %p6000_p8 = por %p5999_p7, %p5998_p5 }
  0x27   : > { %p5996_p4 = pneg %p5995_p3  ;;  %p6002_p9 = por %p6001_p10, %p6000_p8 }
  0x29   : > { %p6003_p0 = pnand %p6002_p9, %p5996_p4 }
  0x2b   : > { %6006 = shalt.err (!%p6003_p0)
}
  0x2c   : > { %s6007_s6 = scalar_lea.vmem %s6297_s11, 128  ;;  %s6188_s10 = smov [#allocation5]  }
  0x2d   : > { %p6008_p1 = scmp.ne.s32.totalorder %s6297_s11, %s6007_s6  ;;  %s6012_s20 = sshll.u32 %s6188_s10, 4  ;;  %s6013_s20 = int_to_ptr.vmem [resolvable:$false] %s6012_s20 }
  0x2e   : > { %s6014_s22 = scalar_lea.vmem %s6013_s20, 256  ;;  %p6015_p11 = scmp.lt.s32.totalorder %s6297_s11, %s6013_s20 }
  0x2f   : > { %p6010_p3 = pnand %p6008_p1, %p6306_p2  ;;  %p6016_p6 = scmp.lt.s32.totalorder %s6014_s22, %s6007_s6 }
  0x31   : > { %p6011_p12 = pneg %p6010_p3  ;;  %p6017_p5 = por %p6016_p6, %p6015_p11 }
  0x33   : > { %p6018_p7 = pnand %p6017_p5, %p6011_p12 }
  0x35   : > { %6021 = shalt.err (!%p6018_p7)
}
  0x36   : > { %5925 = dma.hbm_to_vmem [thread:$0]  (!%p6285_p13), %s6294_s9, 128, %s6297_s11, %s6300_s12  }
  0x37   : > { %p244_p9 = scmp.lt.s32.totalorder %s6186_s18, 3  ;;  %s6335_s7 = scalar_lea.hbm %s6923_s0, %s6280_s29 }
  0x38   : > { %p6942_p6 = scmp.ge.s32.totalorder %s6186_s18, 1  ;;  %s178_s6 = scalar_lea.vmem [#allocation2], %s6283_s30 }
  0x39   : > { %s185_s10 = sshll.u32 %s178_s6, 4  ;;  %s175_s20 = scalar_lea.sflag [#allocation3], %s6277_s28  ;;  %s186_s10 = int_to_ptr.vmem [resolvable:$true] %s185_s10 }
  0x3a   : > { %p6339_p11 = pnand %p6942_p6, %p244_p9  ;;  %s6022_s9 = scalar_lea.hbm %s6335_s7, 128 }
  0x3b   : > { %p6023_p12 = scmp.ne.s32.totalorder %s6335_s7, %s6022_s9  ;;  %s6027_s13 = scalar_lea.hbm %s6923_s0, 256 }
  0x3c   : > { %s6943_s8 = scalar_select %p6339_p11, 1, 0 }
  0x3d   : > { %p6025_p0 = pnand %p6023_p12, %p6306_p2  ;;  %p6028_p8 = scmp.lt.u32.totalorder %s6335_s7, %s6923_s0 }
  0x3e   : > { %p6029_p10 = scmp.lt.u32.totalorder %s6027_s13, %s6022_s9  ;;  %p6031_p3 = scmp.lt.u32.totalorder %s6022_s9, %s6335_s7 }
  0x3f   : > { %p6026_p4 = pneg %p6025_p0 }
  0x40   : > { %p6030_p1 = por %p6029_p10, %p6028_p8 }
  0x42   : > { %p6032_p5 = por %p6031_p3, %p6030_p1 }
  0x44   : > { %p6033_p7 = pnand %p6032_p5, %p6026_p4 }
  0x46   : > { %6036 = shalt.err (!%p6033_p7)
}
  0x47   : > { %s6037_s6 = scalar_lea.vmem %s186_s10, 128  ;;  %s6189_s24 = smov [#allocation2]  }
  0x48   : > { %p6038_p9 = scmp.ne.s32.totalorder %s186_s10, %s6037_s6  ;;  %s6042_s17 = sshll.u32 %s6189_s24, 4  ;;  %s6043_s17 = int_to_ptr.vmem [resolvable:$false] %s6042_s17 }
  0x49   : > { %s6044_s11 = scalar_lea.vmem %s6043_s17, 256  ;;  %p6045_p0 = scmp.lt.s32.totalorder %s186_s10, %s6043_s17 }
  0x4a   : > { %p6040_p6 = pnand %p6038_p9, %p6306_p2  ;;  %p6046_p11 = scmp.lt.s32.totalorder %s6044_s11, %s6037_s6 }
  0x4c   : > { %p6041_p12 = pneg %p6040_p6  ;;  %p6047_p13 = por %p6046_p11, %p6045_p0 }
  0x4e   : > { %p6048_p8 = pnand %p6047_p13, %p6041_p12 }
  0x50   : > { %6051 = shalt.err (!%p6048_p8)
}
  0x51   : > { %p6944_p10 = scmp.ne.s32.totalorder %s6939_s5, 0  ;;  %s6366_s22 = scalar_lea.hbm %s6925_s2, %s6280_s29 }
  0x52   : > { %s214_s17 = scalar_lea.vmem [#allocation7], %s6283_s30  ;;  %s6052_s13 = scalar_lea.hbm %s6366_s22, 128 }
  0x53   : > { %5922 = dma.hbm_to_vmem [thread:$0]  (!%p6944_p10), %s6335_s7, 128, %s186_s10, %s175_s20  }
  0x54   : > { %s221_s24 = sshll.u32 %s214_s17, 4  ;;  %p6053_p13 = scmp.ne.s32.totalorder %s6366_s22, %s6052_s13  ;;  %s222_s24 = int_to_ptr.vmem [resolvable:$true] %s221_s24 }
  0x55   : > { %s6057_s7 = scalar_lea.hbm %s6925_s2, 256  ;;  %p6058_p1 = scmp.lt.u32.totalorder %s6366_s22, %s6925_s2 }
  0x56   : > { %p6055_p11 = pnand %p6053_p13, %p6306_p2  ;;  %p6059_p3 = scmp.lt.u32.totalorder %s6057_s7, %s6052_s13 }
  0x57   : > { %p6061_p7 = scmp.lt.u32.totalorder %s6052_s13, %s6366_s22 }
  0x58   : > { %p6056_p4 = pneg %p6055_p11  ;;  %p6060_p5 = por %p6059_p3, %p6058_p1 }
  0x5a   : > { %p6062_p9 = por %p6061_p7, %p6060_p5 }
  0x5c   : > { %p6063_p6 = pnand %p6062_p9, %p6056_p4 }
  0x5e   : > { %6066 = shalt.err (!%p6063_p6)
}
  0x5f   : > { %s6067_s11 = scalar_lea.vmem %s222_s24, 128  ;;  %s6190_s1 = smov [#allocation7]  }
  0x60   : > { %p6068_p12 = scmp.ne.s32.totalorder %s222_s24, %s6067_s11  ;;  %s6072_s9 = sshll.u32 %s6190_s1, 4  ;;  %s6073_s9 = int_to_ptr.vmem [resolvable:$false] %s6072_s9 }
  0x61   : > { %s6074_s17 = scalar_lea.vmem %s6073_s9, 256  ;;  %p6075_p13 = scmp.lt.s32.totalorder %s222_s24, %s6073_s9 }
  0x62   : > { %p6070_p0 = pnand %p6068_p12, %p6306_p2  ;;  %p6076_p11 = scmp.lt.s32.totalorder %s6074_s17, %s6067_s11 }
  0x64   : > { %p6071_p8 = pneg %p6070_p0  ;;  %p6077_p10 = por %p6076_p11, %p6075_p13 }
  0x66   : > { %p6078_p1 = pnand %p6077_p10, %p6071_p8 }
  0x68   : > { %6081 = shalt.err (!%p6078_p1)
}
  0x69   : > { %p6945_p3 = scmp.ne.s32.totalorder %s6939_s5, 0  ;;  %s6391_s6 = scalar_lea.hbm %s6926_s3, %s6280_s29 }
  0x6a   : > { %s232_s7 = scalar_lea.vmem [#allocation8], %s6283_s30  ;;  %s229_s20 = scalar_lea.sflag [#allocation9], %s6277_s28 }
  0x6b   : > { %5928 = dma.hbm_to_vmem [thread:$0]  (!%p6945_p3), %s6366_s22, 128, %s222_s24, %s6300_s12  }
  0x6c   : > { %s239_s10 = sshll.u32 %s232_s7, 4  ;;  %s6082_s11 = scalar_lea.hbm %s6391_s6, 128  ;;  %s240_s10 = int_to_ptr.vmem [resolvable:$true] %s239_s10 }
  0x6d   : > { %p6083_p10 = scmp.ne.s32.totalorder %s6391_s6, %s6082_s11  ;;  %s6087_s22 = scalar_lea.hbm %s6926_s3, 256 }
  0x6e   : > { %p6088_p7 = scmp.lt.u32.totalorder %s6391_s6, %s6926_s3  ;;  %p6089_p9 = scmp.lt.u32.totalorder %s6087_s22, %s6082_s11 }
  0x6f   : > { %p6085_p4 = pnand %p6083_p10, %p6306_p2  ;;  %p6091_p12 = scmp.lt.u32.totalorder %s6082_s11, %s6391_s6 }
  0x70   : > { %p6090_p6 = por %p6089_p9, %p6088_p7 }
  0x71   : > { %p6086_p5 = pneg %p6085_p4 }
  0x72   : > { %p6092_p0 = por %p6091_p12, %p6090_p6 }
  0x74   : > { %p6093_p8 = pnand %p6092_p0, %p6086_p5 }
  0x76   : > { %6096 = shalt.err (!%p6093_p8)
}
  0x77   : > { %s6097_s28 = scalar_lea.vmem %s240_s10, 128  ;;  %s6191_s30 = smov [#allocation8]  }
  0x78   : > { %p6098_p13 = scmp.ne.s32.totalorder %s240_s10, %s6097_s28  ;;  %s6102_s9 = sshll.u32 %s6191_s30, 4  ;;  %s6103_s9 = int_to_ptr.vmem [resolvable:$false] %s6102_s9 }
  0x79   : > { %s6104_s17 = scalar_lea.vmem %s6103_s9, 256  ;;  %p6105_p10 = scmp.lt.s32.totalorder %s240_s10, %s6103_s9 }
  0x7a   : > { %p6100_p11 = pnand %p6098_p13, %p6306_p2  ;;  %p6106_p4 = scmp.lt.s32.totalorder %s6104_s17, %s6097_s28 }
  0x7c   : > { %p6101_p1 = pneg %p6100_p11  ;;  %p6107_p3 = por %p6106_p4, %p6105_p10 }
  0x7e   : > { %p6108_p7 = pnand %p6107_p3, %p6101_p1 }
  0x80   : > { %6111 = shalt.err (!%p6108_p7)
}
  0x81   : > { %p6946_p9 = scmp.ne.s32.totalorder %s6939_s5, 0  ;;  %p6947_p5 = scmp.ne.s32.totalorder %s6943_s8, 0 }
  0x82   : > { %s6415_s14 = sand.u32 (!%p6947_p5), 1, %s6178_s16   ;;  %p6948_p2 = scmp.ne.s32.totalorder (!%p6947_p5), %s6936_s25, 0 }
  0x83   : > { %5931 = dma.hbm_to_vmem [thread:$0]  (!%p6946_p9), %s6391_s6, 128, %s240_s10, %s229_s20  }
  0x84   : > { %248 = sbr.rel (%p6947_p5) target bundleno = 849 (0x351), region = 36  ;;  %s6418_s13 = sshll.u32 (!%p6947_p5), %s6415_s14, 3 }
  0x85   : > { %s251_s23 = scalar_lea.sflag (!%p6947_p5), [#allocation3], %s6415_s14  ;;  %s254_s7 = scalar_lea.vmem (!%p6947_p5), [#allocation2], %s6418_s13 }
  0x8b   : > { %6157 = dma.done.wait (%p6948_p2), %s251_s23, 128  }
  0x8c   : > { %6159 = vsyncadd (%p6948_p2), %s251_s23, 4294967168  ;;  %s259_s5 = sand.u32 1, %s6243_s19   ;;  %s263_s6 = scalar_lea.vmem [#allocation5], %s6418_s13 }
  0x8d   : > { %s260_s8 = scalar_lea.sflag [#allocation6], %s259_s5 }
  0x8e   : > { %6161 = dma.done.wait (%p6948_p2), %s260_s8, 256  }
  0x8f   : > { %6163 = vsyncadd (%p6948_p2), %s260_s8, 4294967040  ;;  %s272_s10 = scalar_lea.vmem [#allocation7], %s6418_s13  ;;  %s278_s20 = scalar_lea.sflag [#allocation9], %s6415_s14 }
  0x90   : > { %s281_s11 = scalar_lea.vmem [#allocation8], %s6418_s13 }
  0x91   : > { %6165 = dma.done.wait (%p6948_p2), %s278_s20, 128  }
  0x92   : > { %6167 = vsyncadd (%p6948_p2), %s278_s20, 4294967168  ;;  %v6192_v0 = vmov 0.0|0.0   ;;  %v6193_v1 = vmov 1.0|1.0   ;;  %vm6194_vm0 = vmmov 0   ;;  %v6195_v2 = vmov 0.0  }
  0x93   : > { %5677 = vmatprep.subr.bf16.mxu0 %v6192_v0  ;;  %5689 = vmatprep.subr.bf16.mxu1 %v6192_v0  ;;  %v6451_v3 = vld [vmem:[%s254_s7] sm:$0xff]  ;;  %vm326_vm1 = vcmask 261120   ;;  %v6454_v4 = vld [vmem:[%s263_s6] sm:$0xff]  ;;  %s4982_s25 = sshll.u32 %s6243_s19, 3  ;;  %vm4713_vm3 = vcmask 7168   ;;  %s4984_s23 = sshll.u32 %s6243_s19, 7 }
  0x94   : > { %5678 = vmatpush3.bf16.msra.mxu0 %v6193_v1  ;;  %5690 = vmatpush3.bf16.msra.mxu1 %v6193_v1  ;;  %v323_v5 = vld [vmem:[%s272_s10] sm:$0xff]  ;;  %v325_v6 = vmul.f32 %v6451_v3, %v6451_v3  ;;  %v763_v7 = vmul.f32 %v6454_v4, %v6454_v4  ;;  %v2511_v9 = vmul.f32 %v6454_v4, %v6451_v3  ;;  %v6486_v24 = vld [vmem:[%s281_s11] sm:$0xff]  ;;  %s320_s5 = scalar_lea.vmem [#allocation10], %s6418_s13  ;;  %s6879_s20 = scalar_lea.hbm %s6927_s4, %s4984_s23 }
  0x95   : > { %5679 = vmatprep.subr.bf16.mxu0 %v6192_v0  ;;  %5691 = vmatprep.subr.bf16.mxu1 %v6192_v0  ;;  %v2074_v8 = vmul.f32 %v323_v5, %v6451_v3  ;;  %v2948_v25 = vmul.f32 %v6486_v24, %v323_v5  ;;  %v3385_v26 = vmul.f32 %v323_v5, %v6454_v4  ;;  %s4829_s8 = sshll.u32 %s320_s5, 4  ;;  %s4816_s19 = scalar_lea.sflag [#allocation4], %s6415_s14  ;;  %s6881_s8 = int_to_ptr.vmem [resolvable:$true] %s4829_s8 }
  0x96   : > { %5205 = vmatprep.mubr.msk.f32.mxu0 %vm6194_vm0, %v6195_v2  ;;  %5253 = vmatprep.mubr.msk.f32.mxu1 %vm6194_vm0, %v6195_v2  ;;  %v328_v10 = vsel %vm326_vm1, %v325_v6, 0  ;;  %v765_v11 = vsel %vm326_vm1, %v763_v7, 0  ;;  %v6474_v15 = vsel %vm326_vm1, %v2511_v9, 0  ;;  %v1200_v29 = vmul.f32 %v323_v5, %v323_v5  ;;  %s6112_s13 = scalar_lea.vmem %s6881_s8, 128  ;;  %p6949_p6 = scmp.ne.s32.totalorder %s6937_s26, 0 }
  0x97   : > { %v6467_v12 = vsel %vm326_vm1, %v2074_v8, 0  ;;  %v6469_v13 = vand.u32 4294901760, %v328_v10  ;;  %v6471_v14 = vand.u32 4294901760, %v765_v11  ;;  %v6493_v27 = vsel %vm326_vm1, %v2948_v25, 0  ;;  %p6113_p3 = scmp.ne.s32.totalorder %s6881_s8, %s6112_s13  ;;  %s6196_s11 = smov [#allocation10]  }
  0x98   : > { %5680 = vmatpush3.bf16.msra.mxu0 %v6193_v1  ;;  %5692 = vmatpush3.bf16.msra.mxu1 %v6193_v1  ;;  %v6496_v28 = vsel %vm326_vm1, %v3385_v26, 0  ;;  %v1637_v30 = vmul.f32 %v6486_v24, %v6486_v24  ;;  %v1202_v31 = vsel %vm326_vm1, %v1200_v29, 0  ;;  %v3822_v43 = vmul.f32 %v6486_v24, %v6451_v3 }
  0x99   : > { %5208 = vmatprep.subr.mxu0 %v6195_v2  ;;  %5256 = vmatprep.subr.mxu1 %v6195_v2  ;;  %v396_v16 = vsub.f32 %v328_v10, %v6469_v13  ;;  %v833_v17 = vsub.f32 %v765_v11, %v6471_v14  ;;  %v6532_v33 = vand.u32 4294901760, %v1202_v31  ;;  %v4259_v44 = vmul.f32 %v6486_v24, %v6454_v4  ;;  %p6114_p12 = pnand %p6113_p3, %p6949_p6 }
  0x9a   : > { %v1639_v32 = vsel %vm326_vm1, %v1637_v30, 0  ;;  %v6579_v45 = vsel %vm326_vm1, %v3822_v43, 0  ;;  %v6615_v47 = vand.u32 4294901760, %v6467_v12  ;;  %v6618_v48 = vand.u32 4294901760, %v6474_v15 }
  0x9b   : > { %v397_v18 = vand.u32 4294901760, %v396_v16  ;;  %v834_v19 = vand.u32 4294901760, %v833_v17  ;;  %v6534_v34 = vand.u32 4294901760, %v1639_v32  ;;  %v1270_v35 = vsub.f32 %v1202_v31, %v6532_v33  ;;  %p6115_p0 = pneg %p6114_p12 }
  0x9c   : > { %v6582_v46 = vsel %vm326_vm1, %v4259_v44, 0  ;;  %v2144_v49 = vsub.f32 %v6467_v12, %v6615_v47  ;;  %v2581_v50 = vsub.f32 %v6474_v15, %v6618_v48  ;;  %v6691_v57 = vand.u32 4294901760, %v6493_v27 }
  0x9d   : > { %v398_v20 = vsub.f32 %v396_v16, %v397_v18  ;;  %v835_v21 = vsub.f32 %v833_v17, %v834_v19  ;;  %v1707_v36 = vsub.f32 %v1639_v32, %v6534_v34  ;;  %v1271_v37 = vand.u32 4294901760, %v1270_v35 }
  0x9e   : > { %v2145_v51 = vand.u32 4294901760, %v2144_v49  ;;  %v2582_v52 = vand.u32 4294901760, %v2581_v50  ;;  %v6694_v58 = vand.u32 4294901760, %v6496_v28  ;;  %v3018_v59 = vsub.f32 %v6493_v27, %v6691_v57 }
  0x9f   : > { %v399_v22 = vand.u32 4294901760, %v398_v20  ;;  %v836_v23 = vand.u32 4294901760, %v835_v21  ;;  %v1708_v38 = vand.u32 4294901760, %v1707_v36  ;;  %v1272_v39 = vsub.f32 %v1270_v35, %v1271_v37 }
  0xa0   : > { %v2146_v53 = vsub.f32 %v2144_v49, %v2145_v51  ;;  %v2583_v54 = vsub.f32 %v2581_v50, %v2582_v52  ;;  %v3455_v60 = vsub.f32 %v6496_v28, %v6694_v58  ;;  %v3019_v61 = vand.u32 4294901760, %v3018_v59 }
  0xa1   : > { %5206 = vmatmul.mubr.f32.vlgmr.msra.gmra.mrb[0].mxu0 %v399_v22  ;;  %5254 = vmatmul.mubr.f32.vlgmr.msra.gmra.mrb[0].mxu1 %v836_v23  ;;  %v1709_v40 = vsub.f32 %v1707_v36, %v1708_v38  ;;  %v1273_v41 = vand.u32 4294901760, %v1272_v39  ;;  %v6767_v6 = vand.u32 4294901760, %v6579_v45  ;;  %v6770_v7 = vand.u32 4294901760, %v6582_v46 }
  0xa2   : > { %5209 = vmatpush3.msra.mxu0 %v6195_v2  ;;  %5257 = vmatpush3.msra.mxu1 %v6195_v2  ;;  %v2147_v55 = vand.u32 4294901760, %v2146_v53  ;;  %v2584_v56 = vand.u32 4294901760, %v2583_v54  ;;  %v3456_v62 = vand.u32 4294901760, %v3455_v60  ;;  %v3020_v63 = vsub.f32 %v3018_v59, %v3019_v61 }
  0xa3   : > { %5210 = vmatprep.mubr.msk.f32.mxu0 %vm6194_vm0, %v6195_v2  ;;  %5258 = vmatprep.mubr.msk.f32.mxu1 %vm6194_vm0, %v6195_v2  ;;  %v1710_v42 = vand.u32 4294901760, %v1709_v40  ;;  %v3892_v8 = vsub.f32 %v6579_v45, %v6767_v6  ;;  %v4329_v9 = vsub.f32 %v6582_v46, %v6770_v7 }
  0xa4   : > { %5213 = vmatprep.subr.mxu0 %v6195_v2  ;;  %5261 = vmatprep.subr.mxu1 %v6195_v2  ;;  %v3457_v3 = vsub.f32 %v3455_v60, %v3456_v62  ;;  %v3021_v4 = vand.u32 4294901760, %v3020_v63 }
  0xa5   : > { %v3893_v10 = vand.u32 4294901760, %v3892_v8  ;;  %v4330_v11 = vand.u32 4294901760, %v4329_v9 }
  0xa6   : > { %v3458_v5 = vand.u32 4294901760, %v3457_v3 }
  0xa7   : > { %v3894_v12 = vsub.f32 %v3892_v8, %v3893_v10 }
  0xa9   : > { %5211 = vmatmul.mubr.f32.vlgmr.msra.gmra.mrb[0].mxu0 %v6469_v13  ;;  %5259 = vmatmul.mubr.f32.vlgmr.msra.gmra.mrb[0].mxu1 %v6471_v14 }
  0xaa   : > { %5214 = vmatpush3.msra.mxu0 %v6195_v2  ;;  %5262 = vmatpush3.msra.mxu1 %v6195_v2 }
  0xab   : > { %5215 = vmatprep.mubr.msk.f32.mxu0 %vm6194_vm0, %v6195_v2  ;;  %5263 = vmatprep.mubr.msk.f32.mxu1 %vm6194_vm0, %v6195_v2 }
  0xac   : > { %5681 = vmatprep.subr.bf16.mxu0 %v6192_v0  ;;  %5693 = vmatprep.subr.bf16.mxu1 %v6192_v0 }
  0xb1   : > { %5216 = vmatmul.mubr.f32.vlgmr.msra.gmra.mrb[0].mxu0 %v396_v16  ;;  %5264 = vmatmul.mubr.f32.vlgmr.msra.gmra.mrb[0].mxu1 %v833_v17 }
  0xb2   : > { %5682 = vmatpush3.bf16.msra.mxu0 %v6193_v1  ;;  %5694 = vmatpush3.bf16.msra.mxu1 %v6193_v1 }
  0xb3   : > { %5683 = vmatprep.subr.bf16.mxu0 %v6192_v0  ;;  %5695 = vmatprep.subr.bf16.mxu1 %v6192_v0 }
  0xb4   : > { %5226 = vmatprep.mubr.msk.f32.mxu0 %vm6194_vm0, %v6195_v2  ;;  %5274 = vmatprep.mubr.msk.f32.mxu1 %vm6194_vm0, %v6195_v2 }
  0xb6   : > { %5684 = vmatpush3.bf16.msra.mxu0 %v6193_v1  ;;  %5696 = vmatpush3.bf16.msra.mxu1 %v6193_v1 }
  0xb7   : > { %5229 = vmatprep.subr.mxu0 %v6195_v2  ;;  %5277 = vmatprep.subr.mxu1 %v6195_v2 }
  0xb9   : > { %5227 = vmatmul.mubr.f32.vlgmr.msra.gmra.mrb[0].mxu0 %v397_v18  ;;  %5275 = vmatmul.mubr.f32.vlgmr.msra.gmra.mrb[0].mxu1 %v834_v19 }
  0xba   : > { %5230 = vmatpush3.msra.mxu0 %v6195_v2  ;;  %5278 = vmatpush3.msra.mxu1 %v6195_v2 }
  0xbb   : > { %5231 = vmatprep.mubr.msk.f32.mxu0 %vm6194_vm0, %v6195_v2  ;;  %5685 = vmatprep.subr.bf16.mxu0 %v6192_v0 }
  0xbc   : > { %5279 = vmatprep.mubr.msk.f32.mxu1 %vm6194_vm0, %v6195_v2  ;;  %5697 = vmatprep.subr.bf16.mxu1 %v6192_v0 }
  0xc1   : > { %5232 = vmatmul.mubr.f32.vlgmr.msra.gmra.mrb[0].mxu0 %v6469_v13  ;;  %5280 = vmatmul.mubr.f32.vlgmr.msra.gmra.mrb[0].mxu1 %v6471_v14 }
  0xc2   : > { %5686 = vmatpush3.bf16.msra.mxu0 %v6193_v1  ;;  %5698 = vmatpush3.bf16.msra.mxu1 %v6193_v1 }
  0xc3   : > { %5687 = vmatprep.subr.bf16.mxu0 %v6192_v0  ;;  %5699 = vmatprep.subr.bf16.mxu1 %v6192_v0 }
  0xc4   : > { %5242 = vmatprep.mubr.msk.f32.mxu0 %vm6194_vm0, %v6195_v2  ;;  %5290 = vmatprep.mubr.msk.f32.mxu1 %vm6194_vm0, %v6195_v2 }
  0xc6   : > { %5688 = vmatpush3.bf16.msra.mxu0 %v6193_v1  ;;  %5700 = vmatpush3.bf16.msra.mxu1 %v6193_v1 }
  0xc7   : > { %5701 = vmatprep.subr.bf16.mxu0 %v6192_v0  ;;  %5713 = vmatprep.subr.bf16.mxu1 %v6192_v0 }
  0xc9   : > { %5243 = vmatmul.mubr.f32.vlgmr.msra.gmra.mrb[0].mxu0 %v6469_v13  ;;  %5291 = vmatmul.mubr.f32.vlgmr.msra.gmra.mrb[0].mxu1 %v6471_v14  ;;  %v4331_v13 = vsub.f32 %v4329_v9, %v4330_v11  ;;  %v3895_v14 = vand.u32 4294901760, %v3894_v12 }
  0xca   : > { %5702 = vmatpush3.bf16.msra.mxu0 %v6193_v1  ;;  %5714 = vmatpush3.bf16.msra.mxu1 %v6193_v1 }
  0xcb   : > { %5703 = vmatprep.subr.bf16.mxu0 %v6192_v0  ;;  %5715 = vmatprep.subr.bf16.mxu1 %v6192_v0  ;;  %v4332_v15 = vand.u32 4294901760, %v4331_v13 }
  0xcc   : > { %5301 = vmatprep.mubr.msk.f32.mxu0 %vm6194_vm0, %v6195_v2  ;;  %5349 = vmatprep.mubr.msk.f32.mxu1 %vm6194_vm0, %v6195_v2 }
  0xce   : > { %5704 = vmatpush3.bf16.msra.mxu0 %v6193_v1  ;;  %5716 = vmatpush3.bf16.msra.mxu1 %v6193_v1 }
  0xcf   : > { %5304 = vmatprep.subr.mxu0 %v6195_v2  ;;  %5352 = vmatprep.subr.mxu1 %v6195_v2 }
  0xd1   : > { %5302 = vmatmul.mubr.f32.vlgmr.msra.gmra.mrb[2].mxu0 %v1273_v41  ;;  %5350 = vmatmul.mubr.f32.vlgmr.msra.gmra.mrb[2].mxu1 %v1710_v42 }
  0xd2   : > { %5305 = vmatpush3.msra.mxu0 %v6195_v2  ;;  %5353 = vmatpush3.msra.mxu1 %v6195_v2 }
  0xd3   : > { %5306 = vmatprep.mubr.msk.f32.mxu0 %vm6194_vm0, %v6195_v2  ;;  %5354 = vmatprep.mubr.msk.f32.mxu1 %vm6194_vm0, %v6195_v2 }
  0xd4   : > { %5309 = vmatprep.subr.mxu0 %v6195_v2  ;;  %5357 = vmatprep.subr.mxu1 %v6195_v2 }
  0xd9   : > { %5307 = vmatmul.mubr.f32.vlgmr.msra.gmra.mrb[2].mxu0 %v6532_v33  ;;  %5355 = vmatmul.mubr.f32.vlgmr.msra.gmra.mrb[2].mxu1 %v6534_v34 }
  0xda   : > { %5310 = vmatpush3.msra.mxu0 %v6195_v2  ;;  %5358 = vmatpush3.msra.mxu1 %v6195_v2 }
  0xdb   : > { %5311 = vmatprep.mubr.msk.f32.mxu0 %vm6194_vm0, %v6195_v2  ;;  %5359 = vmatprep.mubr.msk.f32.mxu1 %vm6194_vm0, %v6195_v2 }
  0xdc   : > { %5705 = vmatprep.subr.bf16.mxu0 %v6192_v0  ;;  %5717 = vmatprep.subr.bf16.mxu1 %v6192_v0 }
  0xe1   : > { %5312 = vmatmul.mubr.f32.vlgmr.msra.gmra.mrb[2].mxu0 %v1270_v35  ;;  %5360 = vmatmul.mubr.f32.vlgmr.msra.gmra.mrb[2].mxu1 %v1707_v36  ;;  %v4705_v35 = vlaneseq }
  0xe2   : > { %5706 = vmatpush3.bf16.msra.mxu0 %v6193_v1  ;;  %5718 = vmatpush3.bf16.msra.mxu1 %v6193_v1 }
  0xe3   : > { %5707 = vmatprep.subr.bf16.mxu0 %v6192_v0  ;;  %5719 = vmatprep.subr.bf16.mxu1 %v6192_v0  ;;  %v6857_v36 = vshrl.u32 %v4705_v35, 7 }
  0xe4   : > { %5322 = vmatprep.mubr.msk.f32.mxu0 %vm6194_vm0, %v6195_v2  ;;  %5370 = vmatprep.mubr.msk.f32.mxu1 %vm6194_vm0, %v6195_v2 }
  0xe5   : > { %vm4809_vm4 = vcmp.eq.s32.totalorder %v6857_v36, 1  ;;  %vm4808_vm5 = vcmp.eq.s32.totalorder %v6857_v36, 0 }
  0xe6   : > { %5708 = vmatpush3.bf16.msra.mxu0 %v6193_v1  ;;  %5720 = vmatpush3.bf16.msra.mxu1 %v6193_v1 }
  0xe7   : > { %5325 = vmatprep.subr.mxu0 %v6195_v2  ;;  %5373 = vmatprep.subr.mxu1 %v6195_v2 }
  0xe9   : > { %5323 = vmatmul.mubr.f32.vlgmr.msra.gmra.mrb[2].mxu0 %v1271_v37  ;;  %5371 = vmatmul.mubr.f32.vlgmr.msra.gmra.mrb[2].mxu1 %v1708_v38  ;;  %v4707_v37 = vstv %s4982_s25  ;;  %s6116_s25 = sshll.u32 %s6196_s11, 4  ;;  %s6117_s25 = int_to_ptr.vmem [resolvable:$false] %s6116_s25 }
  0xea   : > { %5326 = vmatpush3.msra.mxu0 %v6195_v2  ;;  %5374 = vmatpush3.msra.mxu1 %v6195_v2  ;;  %v4708_v38 = vadd.s32 %v4707_v37, %v6857_v36  ;;  %p6119_p8 = scmp.lt.s32.totalorder %s6881_s8, %s6117_s25 }
  0xeb   : > { %5327 = vmatprep.mubr.msk.f32.mxu0 %vm6194_vm0, %v6195_v2  ;;  %5709 = vmatprep.subr.bf16.mxu0 %v6192_v0 }
  0xec   : > { %5375 = vmatprep.mubr.msk.f32.mxu1 %vm6194_vm0, %v6195_v2  ;;  %5721 = vmatprep.subr.bf16.mxu1 %v6192_v0  ;;  %vm4709_vm2 = vcmp.lt.s32.totalorder %v4708_v38, 12 }
  0xf1   : > { %5328 = vmatmul.mubr.f32.vlgmr.msra.gmra.mrb[2].mxu0 %v6532_v33  ;;  %5376 = vmatmul.mubr.f32.vlgmr.msra.gmra.mrb[2].mxu1 %v6534_v34 }
  0xf2   : > { %5710 = vmatpush3.bf16.msra.mxu0 %v6193_v1  ;;  %5722 = vmatpush3.bf16.msra.mxu1 %v6193_v1 }
  0xf3   : > { %5711 = vmatprep.subr.bf16.mxu0 %v6192_v0  ;;  %5723 = vmatprep.subr.bf16.mxu1 %v6192_v0 }
  0xf4   : > { %5338 = vmatprep.mubr.msk.f32.mxu0 %vm6194_vm0, %v6195_v2  ;;  %5386 = vmatprep.mubr.msk.f32.mxu1 %vm6194_vm0, %v6195_v2 }
  0xf6   : > { %5712 = vmatpush3.bf16.msra.mxu0 %v6193_v1  ;;  %5724 = vmatpush3.bf16.msra.mxu1 %v6193_v1 }
  0xf7   : > { %5725 = vmatprep.subr.bf16.mxu0 %v6192_v0  ;;  %5737 = vmatprep.subr.bf16.mxu1 %v6192_v0 }
  0xf9   : > { %5339 = vmatmul.mubr.f32.vlgmr.msra.gmra.mrb[2].mxu0 %v6532_v33  ;;  %5387 = vmatmul.mubr.f32.vlgmr.msra.gmra.mrb[2].mxu1 %v6534_v34 }
  0xfa   : > { %5726 = vmatpush3.bf16.msra.mxu0 %v6193_v1  ;;  %5738 = vmatpush3.bf16.msra.mxu1 %v6193_v1 }
  0xfb   : > { %5727 = vmatprep.subr.bf16.mxu0 %v6192_v0  ;;  %5739 = vmatprep.subr.bf16.mxu1 %v6192_v0 }
  0xfc   : > { %5397 = vmatprep.mubr.msk.f32.mxu0 %vm6194_vm0, %v6195_v2  ;;  %5445 = vmatprep.mubr.msk.f32.mxu1 %vm6194_vm0, %v6195_v2 }
  0xfe   : > { %5728 = vmatpush3.bf16.msra.mxu0 %v6193_v1  ;;  %5740 = vmatpush3.bf16.msra.mxu1 %v6193_v1 }
  0xff   : > { %5400 = vmatprep.subr.mxu0 %v6195_v2  ;;  %5448 = vmatprep.subr.mxu1 %v6195_v2 }
 0x101   : > { %5398 = vmatmul.mubr.f32.vlgmr.msra.gmra.mrb[4].mxu0 %v2147_v55  ;;  %5446 = vmatmul.mubr.f32.vlgmr.msra.gmra.mrb[4].mxu1 %v2584_v56 }
 0x102   : > { %5401 = vmatpush3.msra.mxu0 %v6195_v2  ;;  %5449 = vmatpush3.msra.mxu1 %v6195_v2 }
 0x103   : > { %5402 = vmatprep.mubr.msk.f32.mxu0 %vm6194_vm0, %v6195_v2  ;;  %5450 = vmatprep.mubr.msk.f32.mxu1 %vm6194_vm0, %v6195_v2 }
 0x104   : > { %5405 = vmatprep.subr.mxu0 %v6195_v2  ;;  %5453 = vmatprep.subr.mxu1 %v6195_v2 }
 0x109   : > { %5403 = vmatmul.mubr.f32.vlgmr.msra.gmra.mrb[4].mxu0 %v6615_v47  ;;  %5451 = vmatmul.mubr.f32.vlgmr.msra.gmra.mrb[4].mxu1 %v6618_v48 }
 0x10a   : > { %5406 = vmatpush3.msra.mxu0 %v6195_v2  ;;  %5454 = vmatpush3.msra.mxu1 %v6195_v2 }
 0x10b   : > { %5407 = vmatprep.mubr.msk.f32.mxu0 %vm6194_vm0, %v6195_v2  ;;  %5455 = vmatprep.mubr.msk.f32.mxu1 %vm6194_vm0, %v6195_v2 }
 0x10c   : > { %5729 = vmatprep.subr.bf16.mxu0 %v6192_v0  ;;  %5741 = vmatprep.subr.bf16.mxu1 %v6192_v0 }
 0x111   : > { %5408 = vmatmul.mubr.f32.vlgmr.msra.gmra.mrb[4].mxu0 %v2144_v49  ;;  %5456 = vmatmul.mubr.f32.vlgmr.msra.gmra.mrb[4].mxu1 %v2581_v50 }
 0x112   : > { %5730 = vmatpush3.bf16.msra.mxu0 %v6193_v1  ;;  %5742 = vmatpush3.bf16.msra.mxu1 %v6193_v1 }
 0x113   : > { %5731 = vmatprep.subr.bf16.mxu0 %v6192_v0  ;;  %5743 = vmatprep.subr.bf16.mxu1 %v6192_v0 }
 0x114   : > { %5418 = vmatprep.mubr.msk.f32.mxu0 %vm6194_vm0, %v6195_v2  ;;  %5466 = vmatprep.mubr.msk.f32.mxu1 %vm6194_vm0, %v6195_v2 }
 0x116   : > { %5732 = vmatpush3.bf16.msra.mxu0 %v6193_v1  ;;  %5744 = vmatpush3.bf16.msra.mxu1 %v6193_v1 }
 0x117   : > { %5421 = vmatprep.subr.mxu0 %v6195_v2  ;;  %5469 = vmatprep.subr.mxu1 %v6195_v2 }
 0x119   : > { %5419 = vmatmul.mubr.f32.vlgmr.msra.gmra.mrb[4].mxu0 %v2145_v51  ;;  %5467 = vmatmul.mubr.f32.vlgmr.msra.gmra.mrb[4].mxu1 %v2582_v52 }
 0x11a   : > { %5422 = vmatpush3.msra.mxu0 %v6195_v2  ;;  %5470 = vmatpush3.msra.mxu1 %v6195_v2 }
 0x11b   : > { %5423 = vmatprep.mubr.msk.f32.mxu0 %vm6194_vm0, %v6195_v2  ;;  %5733 = vmatprep.subr.bf16.mxu0 %v6192_v0 }
 0x11c   : > { %5471 = vmatprep.mubr.msk.f32.mxu1 %vm6194_vm0, %v6195_v2  ;;  %5745 = vmatprep.subr.bf16.mxu1 %v6192_v0 }
 0x121   : > { %5424 = vmatmul.mubr.f32.vlgmr.msra.gmra.mrb[4].mxu0 %v6615_v47  ;;  %5472 = vmatmul.mubr.f32.vlgmr.msra.gmra.mrb[4].mxu1 %v6618_v48 }
 0x122   : > { %5734 = vmatpush3.bf16.msra.mxu0 %v6193_v1  ;;  %5746 = vmatpush3.bf16.msra.mxu1 %v6193_v1 }
 0x123   : > { %5735 = vmatprep.subr.bf16.mxu0 %v6192_v0  ;;  %5747 = vmatprep.subr.bf16.mxu1 %v6192_v0 }
 0x124   : > { %5434 = vmatprep.mubr.msk.f32.mxu0 %vm6194_vm0, %v6195_v2  ;;  %5482 = vmatprep.mubr.msk.f32.mxu1 %vm6194_vm0, %v6195_v2 }
 0x126   : > { %5736 = vmatpush3.bf16.msra.mxu0 %v6193_v1  ;;  %5748 = vmatpush3.bf16.msra.mxu1 %v6193_v1 }
 0x127   : > { %5749 = vmatprep.subr.bf16.mxu0 %v6192_v0  ;;  %5761 = vmatprep.subr.bf16.mxu1 %v6192_v0 }
 0x129   : > { %5435 = vmatmul.mubr.f32.vlgmr.msra.gmra.mrb[4].mxu0 %v6615_v47  ;;  %5483 = vmatmul.mubr.f32.vlgmr.msra.gmra.mrb[4].mxu1 %v6618_v48 }
 0x12a   : > { %5750 = vmatpush3.bf16.msra.mxu0 %v6193_v1  ;;  %5762 = vmatpush3.bf16.msra.mxu1 %v6193_v1 }
 0x12b   : > { %5751 = vmatprep.subr.bf16.mxu0 %v6192_v0  ;;  %5763 = vmatprep.subr.bf16.mxu1 %v6192_v0 }
 0x12c   : > { %5493 = vmatprep.mubr.msk.f32.mxu0 %vm6194_vm0, %v6195_v2  ;;  %5541 = vmatprep.mubr.msk.f32.mxu1 %vm6194_vm0, %v6195_v2 }
 0x12e   : > { %5752 = vmatpush3.bf16.msra.mxu0 %v6193_v1  ;;  %5764 = vmatpush3.bf16.msra.mxu1 %v6193_v1 }
 0x12f   : > { %5496 = vmatprep.subr.mxu0 %v6195_v2  ;;  %5544 = vmatprep.subr.mxu1 %v6195_v2 }
 0x131   : > { %5494 = vmatmul.mubr.f32.vlgmr.msra.gmra.mrb[6].mxu0 %v3021_v4  ;;  %5542 = vmatmul.mubr.f32.vlgmr.msra.gmra.mrb[6].mxu1 %v3458_v5 }
 0x132   : > { %5497 = vmatpush3.msra.mxu0 %v6195_v2  ;;  %5545 = vmatpush3.msra.mxu1 %v6195_v2 }
 0x133   : > { %5498 = vmatprep.mubr.msk.f32.mxu0 %vm6194_vm0, %v6195_v2  ;;  %5546 = vmatprep.mubr.msk.f32.mxu1 %vm6194_vm0, %v6195_v2 }
 0x134   : > { %5501 = vmatprep.subr.mxu0 %v6195_v2  ;;  %5549 = vmatprep.subr.mxu1 %v6195_v2 }
 0x139   : > { %5499 = vmatmul.mubr.f32.vlgmr.msra.gmra.mrb[6].mxu0 %v6691_v57  ;;  %5547 = vmatmul.mubr.f32.vlgmr.msra.gmra.mrb[6].mxu1 %v6694_v58 }
 0x13a   : > { %5502 = vmatpush3.msra.mxu0 %v6195_v2  ;;  %5550 = vmatpush3.msra.mxu1 %v6195_v2 }
 0x13b   : > { %5503 = vmatprep.mubr.msk.f32.mxu0 %vm6194_vm0, %v6195_v2  ;;  %5551 = vmatprep.mubr.msk.f32.mxu1 %vm6194_vm0, %v6195_v2 }
 0x13c   : > { %5753 = vmatprep.subr.bf16.mxu0 %v6192_v0  ;;  %5765 = vmatprep.subr.bf16.mxu1 %v6192_v0 }
 0x141   : > { %5504 = vmatmul.mubr.f32.vlgmr.msra.gmra.mrb[6].mxu0 %v3018_v59  ;;  %5552 = vmatmul.mubr.f32.vlgmr.msra.gmra.mrb[6].mxu1 %v3455_v60 }
 0x142   : > { %5754 = vmatpush3.bf16.msra.mxu0 %v6193_v1  ;;  %5766 = vmatpush3.bf16.msra.mxu1 %v6193_v1 }
 0x143   : > { %5755 = vmatprep.subr.bf16.mxu0 %v6192_v0  ;;  %5767 = vmatprep.subr.bf16.mxu1 %v6192_v0 }
 0x144   : > { %5514 = vmatprep.mubr.msk.f32.mxu0 %vm6194_vm0, %v6195_v2  ;;  %5562 = vmatprep.mubr.msk.f32.mxu1 %vm6194_vm0, %v6195_v2 }
 0x146   : > { %5756 = vmatpush3.bf16.msra.mxu0 %v6193_v1  ;;  %5768 = vmatpush3.bf16.msra.mxu1 %v6193_v1 }
 0x147   : > { %5517 = vmatprep.subr.mxu0 %v6195_v2  ;;  %5565 = vmatprep.subr.mxu1 %v6195_v2 }
 0x149   : > { %5515 = vmatmul.mubr.f32.vlgmr.msra.gmra.mrb[6].mxu0 %v3019_v61  ;;  %5563 = vmatmul.mubr.f32.vlgmr.msra.gmra.mrb[6].mxu1 %v3456_v62 }
 0x14a   : > { %5518 = vmatpush3.msra.mxu0 %v6195_v2  ;;  %5566 = vmatpush3.msra.mxu1 %v6195_v2 }
 0x14b   : > { %5519 = vmatprep.mubr.msk.f32.mxu0 %vm6194_vm0, %v6195_v2  ;;  %5757 = vmatprep.subr.bf16.mxu0 %v6192_v0 }
 0x14c   : > { %5567 = vmatprep.mubr.msk.f32.mxu1 %vm6194_vm0, %v6195_v2  ;;  %5769 = vmatprep.subr.bf16.mxu1 %v6192_v0 }
 0x151   : > { %5520 = vmatmul.mubr.f32.vlgmr.msra.gmra.mrb[6].mxu0 %v6691_v57  ;;  %5568 = vmatmul.mubr.f32.vlgmr.msra.gmra.mrb[6].mxu1 %v6694_v58 }
 0x152   : > { %5758 = vmatpush3.bf16.msra.mxu0 %v6193_v1  ;;  %5770 = vmatpush3.bf16.msra.mxu1 %v6193_v1 }
 0x153   : > { %5759 = vmatprep.subr.bf16.mxu0 %v6192_v0  ;;  %5771 = vmatprep.subr.bf16.mxu1 %v6192_v0 }
 0x154   : > { %5530 = vmatprep.mubr.msk.f32.mxu0 %vm6194_vm0, %v6195_v2  ;;  %5578 = vmatprep.mubr.msk.f32.mxu1 %vm6194_vm0, %v6195_v2 }
 0x156   : > { %5760 = vmatpush3.bf16.msra.mxu0 %v6193_v1  ;;  %5772 = vmatpush3.bf16.msra.mxu1 %v6193_v1 }
 0x157   : > { %5773 = vmatprep.subr.bf16.mxu0 %v6192_v0  ;;  %5785 = vmatprep.subr.bf16.mxu1 %v6192_v0 }
 0x159   : > { %5531 = vmatmul.mubr.f32.vlgmr.msra.gmra.mrb[6].mxu0 %v6691_v57  ;;  %5579 = vmatmul.mubr.f32.vlgmr.msra.gmra.mrb[6].mxu1 %v6694_v58 }
 0x15a   : > { %5774 = vmatpush3.bf16.msra.mxu0 %v6193_v1  ;;  %5786 = vmatpush3.bf16.msra.mxu1 %v6193_v1 }
 0x15b   : > { %5775 = vmatprep.subr.bf16.mxu0 %v6192_v0  ;;  %5787 = vmatprep.subr.bf16.mxu1 %v6192_v0 }
 0x15c   : > { %5589 = vmatprep.mubr.msk.f32.mxu0 %vm6194_vm0, %v6195_v2  ;;  %5637 = vmatprep.mubr.msk.f32.mxu1 %vm6194_vm0, %v6195_v2 }
 0x15e   : > { %5776 = vmatpush3.bf16.msra.mxu0 %v6193_v1  ;;  %5788 = vmatpush3.bf16.msra.mxu1 %v6193_v1 }
 0x15f   : > { %5592 = vmatprep.subr.mxu0 %v6195_v2  ;;  %5640 = vmatprep.subr.mxu1 %v6195_v2 }
 0x161   : > { %5590 = vmatmul.mubr.f32.vlgmr.msra.gmra.mrb[8].mxu0 %v3895_v14  ;;  %5638 = vmatmul.mubr.f32.vlgmr.msra.gmra.mrb[8].mxu1 %v4332_v15 }
 0x162   : > { %5593 = vmatpush3.msra.mxu0 %v6195_v2  ;;  %5641 = vmatpush3.msra.mxu1 %v6195_v2 }
 0x163   : > { %5594 = vmatprep.mubr.msk.f32.mxu0 %vm6194_vm0, %v6195_v2  ;;  %5642 = vmatprep.mubr.msk.f32.mxu1 %vm6194_vm0, %v6195_v2 }
 0x164   : > { %5597 = vmatprep.subr.mxu0 %v6195_v2  ;;  %5645 = vmatprep.subr.mxu1 %v6195_v2 }
 0x169   : > { %5595 = vmatmul.mubr.f32.vlgmr.msra.gmra.mrb[8].mxu0 %v6767_v6  ;;  %5643 = vmatmul.mubr.f32.vlgmr.msra.gmra.mrb[8].mxu1 %v6770_v7 }
 0x16a   : > { %5598 = vmatpush3.msra.mxu0 %v6195_v2  ;;  %5646 = vmatpush3.msra.mxu1 %v6195_v2 }
 0x16b   : > { %5599 = vmatprep.mubr.msk.f32.mxu0 %vm6194_vm0, %v6195_v2  ;;  %5647 = vmatprep.mubr.msk.f32.mxu1 %vm6194_vm0, %v6195_v2 }
 0x16c   : > { %5777 = vmatprep.subr.bf16.mxu0 %v6192_v0  ;;  %5789 = vmatprep.subr.bf16.mxu1 %v6192_v0 }
 0x171   : > { %5600 = vmatmul.mubr.f32.vlgmr.msra.gmra.mrb[8].mxu0 %v3892_v8  ;;  %5648 = vmatmul.mubr.f32.vlgmr.msra.gmra.mrb[8].mxu1 %v4329_v9 }
 0x172   : > { %5778 = vmatpush3.bf16.msra.mxu0 %v6193_v1  ;;  %5790 = vmatpush3.bf16.msra.mxu1 %v6193_v1 }
 0x173   : > { %5779 = vmatprep.subr.bf16.mxu0 %v6192_v0  ;;  %5791 = vmatprep.subr.bf16.mxu1 %v6192_v0 }
 0x174   : > { %5610 = vmatprep.mubr.msk.f32.mxu0 %vm6194_vm0, %v6195_v2  ;;  %5658 = vmatprep.mubr.msk.f32.mxu1 %vm6194_vm0, %v6195_v2 }
 0x176   : > { %5780 = vmatpush3.bf16.msra.mxu0 %v6193_v1  ;;  %5792 = vmatpush3.bf16.msra.mxu1 %v6193_v1 }
 0x177   : > { %5613 = vmatprep.subr.mxu0 %v6195_v2  ;;  %5661 = vmatprep.subr.mxu1 %v6195_v2 }
 0x179   : > { %5611 = vmatmul.mubr.f32.vlgmr.msra.gmra.mrb[8].mxu0 %v3893_v10  ;;  %5659 = vmatmul.mubr.f32.vlgmr.msra.gmra.mrb[8].mxu1 %v4330_v11 }
 0x17a   : > { %5614 = vmatpush3.msra.mxu0 %v6195_v2  ;;  %5662 = vmatpush3.msra.mxu1 %v6195_v2 }
 0x17b   : > { %5615 = vmatprep.mubr.msk.f32.mxu0 %vm6194_vm0, %v6195_v2  ;;  %5663 = vmatprep.mubr.msk.f32.mxu1 %vm6194_vm0, %v6195_v2 }
 0x17c   : > { %5781 = vmatprep.subr.bf16.mxu0 %v6192_v0  ;;  %5793 = vmatprep.subr.bf16.mxu1 %v6192_v0 }
 0x181   : > { %5616 = vmatmul.mubr.f32.vlgmr.msra.gmra.mrb[8].mxu0 %v6767_v6  ;;  %5664 = vmatmul.mubr.f32.vlgmr.msra.gmra.mrb[8].mxu1 %v6770_v7 }
 0x182   : > { %5782 = vmatpush3.bf16.msra.mxu0 %v6193_v1  ;;  %5794 = vmatpush3.bf16.msra.mxu1 %v6193_v1 }
 0x183   : > { %5783 = vmatprep.subr.bf16.mxu0 %v6192_v0  ;;  %5795 = vmatprep.subr.bf16.mxu1 %v6192_v0 }
 0x184   : > { %5626 = vmatprep.mubr.msk.f32.mxu0 %vm6194_vm0, %v6195_v2  ;;  %5674 = vmatprep.mubr.msk.f32.mxu1 %vm6194_vm0, %v6195_v2 }
 0x186   : > { %5784 = vmatpush3.bf16.msra.mxu0 %v6193_v1  ;;  %5796 = vmatpush3.bf16.msra.mxu1 %v6193_v1 }
 0x189   : > { %5627 = vmatmul.mubr.f32.vlgmr.msra.gmra.mrb[8].mxu0 %v6767_v6  ;;  %5675 = vmatmul.mubr.f32.vlgmr.msra.gmra.mrb[8].mxu1 %v6770_v7 }
 0x19c   : > { %v759_v16 = vpop.f32.mrb[0].mxu0  ;;  %v1196_v17 = vpop.f32.mrb[0].mxu1 }
 0x19d   : > { %v4696_v18 = vmax.f32 %v759_v16, 1e-24  ;;  %v4698_v19 = vmax.f32 %v1196_v17, 1e-24  ;;  %v5244_v20 = vpop.f32.mrb[1].mxu0  ;;  %v5292_v0 = vpop.f32.mrb[1].mxu1 }
 0x19f   : > { %5974 = vrsqrt.f32 %v4696_v18 }
 0x1a0   : > { %5976 = vrsqrt.f32 %v4698_v19 }
 0x1a9   : > { %v5975_v21 = vpop.eup %5974 }
 0x1aa   : > { %v5977_v22 = vpop.eup %5976 }
 0x1ab   : > { %v4724_v23 = vmul.f32 %v5977_v22, %v5975_v21 }
 0x1cc   : > { %v1633_v2 = vpop.f32.mrb[2].mxu0  ;;  %v2070_v24 = vpop.f32.mrb[2].mxu1 }
 0x1cd   : > { %v4700_v25 = vmax.f32 %v1633_v2, 1e-24  ;;  %v4702_v1 = vmax.f32 %v2070_v24, 1e-24  ;;  %v5340_v26 = vpop.f32.mrb[3].mxu0  ;;  %v5388_v27 = vpop.f32.mrb[3].mxu1 }
 0x1cf   : > { %5978 = vrsqrt.f32 %v4700_v25 }
 0x1d0   : > { %5980 = vrsqrt.f32 %v4702_v1 }
 0x1d9   : > { %v5979_v28 = vpop.eup %5978 }
 0x1da   : > { %v5981_v29 = vpop.eup %5980  ;;  %v4710_v30 = vmul.f32 %v5979_v28, %v5975_v21  ;;  %v4757_v31 = vmul.f32 %v5979_v28, %v5977_v22 }
 0x1db   : > { %v4740_v32 = vmul.f32 %v5981_v29, %v5979_v28  ;;  %v4774_v33 = vmul.f32 %v5981_v29, %v5975_v21  ;;  %v4791_v34 = vmul.f32 %v5981_v29, %v5977_v22 }
 0x1fc   : > { %v2507_v39 = vpop.f32.mrb[4].mxu0  ;;  %v2944_v40 = vpop.f32.mrb[4].mxu1 }
 0x1fd   : > { %v4711_v41 = vmul.f32 %v4710_v30, %v2507_v39  ;;  %v4725_v42 = vmul.f32 %v4724_v23, %v2944_v40  ;;  %v5436_v43 = vpop.f32.mrb[5].mxu0  ;;  %v5484_v44 = vpop.f32.mrb[5].mxu1 }
 0x1ff   : > { %v4726_v45 = vmul.f32 2.0, %v4725_v42  ;;  %v4712_v46 = vsel %vm4709_vm2, %v4711_v41, 0.0 }
 0x200   : > { %v4714_v47 = vsel %vm4713_vm3, %v4712_v46, 0.0 }
 0x201   : > { %v4727_v48 = vmul.f32 1.442695, %v4726_v45  ;;  %4715 = vadd.xlane.f32.xlu0 %v4714_v47 }
 0x203   : > { %5982 = vpow2.f32 %v4727_v48 }
 0x20d   : > { %v5983_v49 = vpop.eup %5982 }
 0x20e   : > { %v4729_v50 = vsel %vm4709_vm2, %v5983_v49, 0.0 }
 0x20f   : > { %v4730_v51 = vsel %vm4713_vm3, %v4729_v50, 0.0 }
 0x210   : > { %4731 = vadd.xlane.f32.xlu0 %v4730_v51 }
 0x22c   : > { %v3381_v52 = vpop.f32.mrb[6].mxu0  ;;  %v3818_v53 = vpop.f32.mrb[6].mxu1 }
 0x22d   : > { %v4741_v54 = vmul.f32 %v4740_v32, %v3381_v52  ;;  %v4758_v55 = vmul.f32 %v4757_v31, %v3818_v53  ;;  %v5532_v56 = vpop.f32.mrb[7].mxu0  ;;  %v5580_v57 = vpop.f32.mrb[7].mxu1 }
 0x22f   : > { %v4742_v58 = vmul.f32 2.0, %v4741_v54  ;;  %v4759_v59 = vmul.f32 2.0, %v4758_v55 }
 0x231   : > { %v4743_v60 = vmul.f32 1.442695, %v4742_v58  ;;  %v4760_v61 = vmul.f32 1.442695, %v4759_v59 }
 0x233   : > { %5984 = vpow2.f32 %v4743_v60 }
 0x234   : > { %5986 = vpow2.f32 %v4760_v61 }
 0x23d   : > { %v5985_v62 = vpop.eup %5984 }
 0x23e   : > { %v5987_v63 = vpop.eup %5986  ;;  %v4745_v3 = vsel %vm4709_vm2, %v5985_v62, 0.0 }
 0x23f   : > { %v4746_v4 = vsel %vm4713_vm3, %v4745_v3, 0.0  ;;  %v4762_v5 = vsel %vm4709_vm2, %v5987_v63, 0.0 }
 0x240   : > { %4747 = vadd.xlane.f32.xlu1 %v4746_v4  ;;  %v4763_v6 = vsel %vm4713_vm3, %v4762_v5, 0.0 }
 0x244   : > { %4764 = vadd.xlane.f32.xlu1 %v4763_v6 }
 0x25c   : > { %v4255_v7 = vpop.f32.mrb[8].mxu0  ;;  %v4692_v8 = vpop.f32.mrb[8].mxu1 }
 0x25d   : > { %v4775_v9 = vmul.f32 %v4774_v33, %v4255_v7  ;;  %v4792_v10 = vmul.f32 %v4791_v34, %v4692_v8  ;;  %v5628_v11 = vpop.f32.mrb[9].mxu0  ;;  %v5676_v12 = vpop.f32.mrb[9].mxu1 }
 0x25f   : > { %v4776_v13 = vmul.f32 2.0, %v4775_v9  ;;  %v4793_v14 = vmul.f32 2.0, %v4792_v10 }
 0x261   : > { %v4777_v15 = vmul.f32 1.442695, %v4776_v13  ;;  %v4794_v16 = vmul.f32 1.442695, %v4793_v14 }
 0x263   : > { %5988 = vpow2.f32 %v4777_v15 }
 0x264   : > { %5990 = vpow2.f32 %v4794_v16 }
 0x26d   : > { %v5989_v17 = vpop.eup %5988 }
 0x26e   : > { %v5991_v18 = vpop.eup %5990  ;;  %v4779_v19 = vsel %vm4709_vm2, %v5989_v17, 0.0 }
 0x26f   : > { %v4796_v20 = vsel %vm4709_vm2, %v5991_v18, 0.0  ;;  %v4780_v0 = vsel %vm4713_vm3, %v4779_v19, 0.0 }
 0x270   : > { %v4797_v21 = vsel %vm4713_vm3, %v4796_v20, 0.0  ;;  %4781 = vadd.xlane.f32.xlu0 %v4780_v0 }
 0x271   : > { %4798 = vadd.xlane.f32.xlu1 %v4797_v21 }
 0x28e   : > { %v4716_v22 = vpop.xlane.xlu0 %4715 }
 0x28f   : > { %v4717_v23 = vrot.slane %v4716_v22, 4 }
 0x291   : > { %v4718_v2 = vadd.f32 %v4717_v23, %v4716_v22 }
 0x293   : > { %v4719_v24 = vrot.slane %v4718_v2, 2 }
 0x295   : > { %v4720_v25 = vadd.f32 %v4719_v24, %v4718_v2 }
 0x297   : > { %v4721_v1 = vrot.slane %v4720_v25, 1 }
 0x299   : > { %v4722_v26 = vadd.f32 %v4721_v1, %v4720_v25 }
 0x29b   : > { %5897 = vpush %v4722_v26 }
 0x29d   : > { %v4732_v27 = vpop.xlane.xlu0 %4731 }
 0x29e   : > { %v4733_v28 = vrot.slane %v4732_v27, 4 }
 0x2a0   : > { %v4734_v29 = vadd.f32 %v4733_v28, %v4732_v27 }
 0x2a2   : > { %v4735_v30 = vrot.slane %v4734_v29, 2 }
 0x2a4   : > { %v4736_v31 = vadd.f32 %v4735_v30, %v4734_v29 }
 0x2a6   : > { %v4737_v32 = vrot.slane %v4736_v31, 1 }
 0x2a8   : > { %v4738_v33 = vadd.f32 %v4737_v32, %v4736_v31 }
 0x2aa   : > { %5899 = vpush %v4738_v33 }
 0x2cc   : > { %s5898_s1 = spop %5897 }
 0x2cd   : > { %v4748_v34 = vpop.xlane.xlu1 %4747  ;;  %v4812_v3 = vstv %s5898_s1  ;;  %s6118_s1 = scalar_lea.vmem %s6117_s25, 256 }
 0x2ce   : > { %v4749_v35 = vrot.slane %v4748_v34, 4  ;;  %p6120_p13 = scmp.lt.s32.totalorder %s6118_s1, %s6112_s13 }
 0x2d0   : > { %v4750_v37 = vadd.f32 %v4749_v35, %v4748_v34  ;;  %p6121_p11 = por %p6120_p13, %p6119_p8 }
 0x2d1   : > { %v4765_v38 = vpop.xlane.xlu1 %4764 }
 0x2d2   : > { %v4751_v39 = vrot.slane %v4750_v37, 2  ;;  %v4766_v40 = vrot.slane %v4765_v38, 4  ;;  %p6122_p1 = pnand %p6121_p11, %p6115_p0 }
 0x2d4   : > { %v4767_v41 = vadd.f32 %v4766_v40, %v4765_v38  ;;  %v4752_v42 = vadd.f32 %v4751_v39, %v4750_v37 }
 0x2d6   : > { %v4768_v43 = vrot.slane %v4767_v41, 2  ;;  %v4753_v44 = vrot.slane %v4752_v42, 1 }
 0x2d8   : > { %v4754_v45 = vadd.f32 %v4753_v44, %v4752_v42  ;;  %v4769_v46 = vadd.f32 %v4768_v43, %v4767_v41 }
 0x2da   : > { %5901 = vpush %v4754_v45  ;;  %v4770_v47 = vrot.slane %v4769_v46, 1 }
 0x2db   : > { %s5900_s12 = spop %5899 }
 0x2dc   : > { %v4771_v48 = vadd.f32 %v4770_v47, %v4769_v46 }
 0x2de   : > { %5903 = vpush %v4771_v48 }
 0x2fd   : > { %v4782_v49 = vpop.xlane.xlu0 %4781 }
 0x2fe   : > { %v4799_v50 = vpop.xlane.xlu1 %4798  ;;  %v4783_v51 = vrot.slane %v4782_v49, 4 }
 0x2ff   : > { %v4800_v52 = vrot.slane %v4799_v50, 4 }
 0x300   : > { %v4784_v53 = vadd.f32 %v4783_v51, %v4782_v49 }
 0x301   : > { %v4801_v54 = vadd.f32 %v4800_v52, %v4799_v50 }
 0x302   : > { %v4785_v55 = vrot.slane %v4784_v53, 2 }
 0x303   : > { %v4802_v56 = vrot.slane %v4801_v54, 2 }
 0x304   : > { %v4786_v57 = vadd.f32 %v4785_v55, %v4784_v53 }
 0x305   : > { %v4803_v58 = vadd.f32 %v4802_v56, %v4801_v54 }
 0x306   : > { %v4787_v59 = vrot.slane %v4786_v57, 1 }
 0x307   : > { %v4804_v60 = vrot.slane %v4803_v58, 1 }
 0x308   : > { %v4788_v61 = vadd.f32 %v4787_v59, %v4786_v57 }
 0x309   : > { %v4805_v62 = vadd.f32 %v4804_v60, %v4803_v58 }
 0x30a   : > { %5905 = vpush %v4788_v61 }
 0x30b   : > { %5907 = vpush %v4805_v62  ;;  %s5902_s22 = spop %5901 }
 0x30c   : > { %s4756_s29 = sadd.f32 %s5902_s22, %s5900_s12 }
 0x30f   : > { %s5904_s24 = spop %5903 }
 0x310   : > { %s4773_s28 = sadd.f32 %s5904_s24, %s4756_s29 }
 0x33b   : > { %s5906_s30 = spop %5905 }
 0x33c   : > { %s4790_s9 = sadd.f32 %s5906_s30, %s4773_s28  ;;  %s5908_s17 = spop %5907 }
 0x33e   : > { %s4807_s7 = sadd.f32 %s5908_s17, %s4790_s9 }
 0x340   : > { %v4810_v63 = vstv %s4807_s7 }
 0x341   : > { %v4811_v4 = vsel %vm4809_vm4, %v4810_v63, 0.0 }
 0x342   : > { %v4813_v5 = vsel %vm4808_vm5, %v4812_v3, %v4811_v4 }
 0x343   : > { %4814 = vst [vmem:[%s320_s5] sm:$0xff] %v4813_v5 }
 0x344   : > { %6125 = shalt.err (!%p6122_p1)
}
 0x345   : > { %s6126_s14 = scalar_lea.hbm %s6879_s20, 128  ;;  %s6130_s24 = scalar_lea.hbm %s6927_s4, 256 }
 0x346   : > { %p6127_p10 = scmp.ne.s32.totalorder %s6879_s20, %s6126_s14  ;;  %p6131_p9 = scmp.lt.u32.totalorder %s6879_s20, %s6927_s4 }
 0x347   : > { %p6132_p5 = scmp.lt.u32.totalorder %s6130_s24, %s6126_s14  ;;  %p6134_p3 = scmp.lt.u32.totalorder %s6126_s14, %s6879_s20 }
 0x348   : > { %p6128_p4 = pnand %p6127_p10, %p6949_p6 }
 0x349   : > { %p6133_p2 = por %p6132_p5, %p6131_p9 }
 0x34a   : > { %p6129_p7 = pneg %p6128_p4 }
 0x34b   : > { %p6135_p12 = por %p6134_p3, %p6133_p2 }
 0x34d   : > { %p6136_p0 = pnand %p6135_p12, %p6129_p7 }
 0x34f   : > { %6139 = shalt.err (!%p6136_p0)
}
 0x350   : > { %5917 = dma.vmem_to_hbm [thread:$0]  (%p6949_p6), %s6881_s8, 128, %s6879_s20, %s4816_s19  }
 0x351 PF: > { %s4841_s30 = sand.u32 1, %s6174_s15   ;;  %p6950_p8 = scmp.ne.s32.totalorder %s6938_s27, 0 }
 0x352   : > { %p6951_p13 = scmp.ge.s32.totalorder %s6186_s18, 2  ;;  %s4842_s9 = scalar_lea.sflag [#allocation4], %s4841_s30 }
 0x354   : > { %p5933_p11 = pnand %p6951_p13, %p6950_p8 }
 0x356   : > { %6169 = dma.done.wait (!%p5933_p11), %s4842_s9, 128  }
 0x357   : > { %6171 = vsyncadd (!%p5933_p11), %s4842_s9, 4294967168  ;;  %s6952_s17 = sld [smem:[#allocation15_spill]]  ;;  %s6953_s23 = sld [smem:[#allocation16_spill]] }
 0x358   : > { %p23_p1 = scmp.ge.s32.totalorder %s6247_s21, 4   ;;  %s6954_s15 = smov %s6178_s16 }
 0x359   : > { %s6957_s18 = smov %s6247_s21 }
 0x35a   :  { %25 = sbr.rel (!%p23_p1) target bundleno = 11 (0xb), region = 118 }
 0x35d   : > { %s6955_s16 = smov %s6952_s17  ;;  %s6956_s17 = smov %s6953_s23 }
 0x361   :  { %4847 = vsyncpa [#allocation3], 1 }
 0x362   :  { %4849 = vsyncpa [#allocation3 + $0x1], 1 }
 0x363   :  { %4850 = vsyncpa [#allocation6], 1 }
 0x364   :  { %4852 = vsyncpa [#allocation6 + $0x1], 1 }
 0x365   :  { %4853 = vsyncpa [#allocation9], 1 }
 0x366   :  { %4855 = vsyncpa [#allocation9 + $0x1], 1 }
 0x367   :  { %4856 = vsyncpa [#allocation4], 1 }
 0x368   :  { %4858 = vsyncpa [#allocation4 + $0x1], 1 }

</bundles_post_ra>
